<compile_context>
chip_gen: v7x
topology: tpu7x:2x2x1
jax: 0.10.0
libtpu: 0.0.40
codegen_flags: <defaults>
</compile_context>

<pallas_src>
import functools
import math

import jax
import jax.numpy as jnp
from jax.experimental import pallas as pl
from jax.experimental.pallas import tpu as pltpu


def _layer_norm(v, gamma, beta, eps=1e-5):
    mu = jnp.mean(v, axis=-1, keepdims=True)
    var = jnp.mean((v - mu) ** 2, axis=-1, keepdims=True)
    return gamma * (v - mu) * jax.lax.rsqrt(var + eps) + beta


def encoder_layer_kernel(len_ref,                       # SMEM (B,) int32   (scalar prefetch)
                         x_ref,                         # VMEM (Bt, S, E)
                         wq_ref, bq_ref, wk_ref, bk_ref, wv_ref, bv_ref,
                         wo_ref, bo_ref, g_ref, b_ref,
                         w1_ref, b1_ref, w2_ref, b2_ref,
                         out_ref,
                         *, heads, attn_dim, matmul_dtype):
    Bt, S, E = x_ref.shape
    D = attn_dim
    b0 = pl.program_id(0) * Bt

    def dense(a, w_ref_, bias_ref_):
        return (jnp.dot(a.astype(matmul_dtype), w_ref_[...].astype(matmul_dtype),
                        preferred_element_type=jnp.float32)
                + bias_ref_[...].astype(jnp.float32))

    # Flatten the batch tile -> bigger M for the projection / FFN matmuls.
    x = x_ref[...].reshape(Bt * S, E).astype(jnp.float32)          # residual path in f32

    # ---- Multi-headed self-attention -------------------------------------
    inv_scale = jnp.float32(1.0 / math.sqrt(D))
    q = dense(x, wq_ref, bq_ref) * inv_scale                       # scale folded into Q once
    k = dense(x, wk_ref, bk_ref)
    v = dense(x, wv_ref, bv_ref)

    col = jax.lax.broadcasted_iota(jnp.int32, (S, S), 1)           # key position index

    ctx_rows = []
    for t in range(Bt):                                            # static loop over batch tile
        valid = col < len_ref[b0 + t]                              # (S, S) key-padding mask
        rows = slice(t * S, (t + 1) * S)
        attn_t = bo_ref[...].astype(jnp.float32)                   # (1, E), broadcasts to (S, E)
        for h in range(heads):                                     # static loop over heads
            cols = slice(h * D, (h + 1) * D)
            qh = q[rows, cols]                                     # (S, D)
            kh = k[rows, cols]
            vh = v[rows, cols]
            # Q K^T without materializing a transpose (contract last dims of both).
            energy = jax.lax.dot_general(
                qh.astype(matmul_dtype), kh.astype(matmul_dtype),
                (((1,), (1,)), ((), ())),
                preferred_element_type=jnp.float32)                # (S, S)
            energy = jnp.where(valid, energy, jnp.float32(-1e10))
            energy = energy - jnp.max(energy, axis=-1, keepdims=True)
            p = jnp.exp(energy)                                    # un-normalized probabilities
            l = jnp.sum(p, axis=-1, keepdims=True)                 # (S, 1)
            o = jnp.dot(p.astype(matmul_dtype), vh.astype(matmul_dtype),
                        preferred_element_type=jnp.float32)        # (S, D)
            # Deferred softmax normalization: scale the (S,D) result instead of the (S,S) probs.
            # (flip approx=True to push the reciprocal onto the EUP at slightly lower precision)
            o = o * pl.reciprocal(l, approx=False)
            # Fold the output projection in per head (row-slice of W_out) -> no lane concatenate.
            attn_t = attn_t + jnp.dot(o.astype(matmul_dtype),
                                      wo_ref[h * D:(h + 1) * D, :].astype(matmul_dtype),
                                      preferred_element_type=jnp.float32)
        ctx_rows.append(attn_t)
    attn_out = ctx_rows[0] if Bt == 1 else jnp.concatenate(ctx_rows, axis=0)   # (Bt*S, E)

    gamma = g_ref[...].astype(jnp.float32)
    beta = b_ref[...].astype(jnp.float32)

    # residual + LayerNorm (dropout = identity in eval)
    x1 = _layer_norm(x + attn_out, gamma, beta)

    # ---- Position-wise feed-forward ---------------------------------------
    h1 = jnp.maximum(dense(x1, w1_ref, b1_ref), 0.0)
    ff = dense(h1, w2_ref, b2_ref)
    x2 = _layer_norm(x1 + ff, gamma, beta)

    out_ref[...] = x2.reshape(Bt, S, E).astype(out_ref.dtype)


def encoder_layer(x, key_lengths, params, *, heads, batch_tile=1):
    """x: (B, S, E); key_lengths: (B,) int32 = number of valid (unmasked) key positions per batch."""
    B, S, E = x.shape
    assert E % heads == 0 and B % batch_tile == 0
    attn_dim = E // heads
    PF = params["w1"].shape[1]
    Bt = batch_tile

    # Grid-invariant full blocks for weights / biases (constant index_map -> DMA'd once).
    rep = lambda shape: pl.BlockSpec(shape, lambda b, L: (0, 0))

    in_specs = [
        pl.BlockSpec((Bt, S, E), lambda b, L: (b, 0, 0)),   # x
        rep((E, E)), rep((1, E)),                           # wq, bq
        rep((E, E)), rep((1, E)),                           # wk, bk
        rep((E, E)), rep((1, E)),                           # wv, bv
        rep((E, E)), rep((1, E)),                           # wo, bo
        rep((1, E)), rep((1, E)),                           # gamma, beta
        rep((E, PF)), rep((1, PF)),                         # w1, b1
        rep((PF, E)), rep((1, E)),                          # w2, b2
    ]

    kernel = functools.partial(
        encoder_layer_kernel,
        heads=heads, attn_dim=attn_dim,
        matmul_dtype=jnp.bfloat16 if x.dtype == jnp.bfloat16 else jnp.float32)

    return pl.pallas_call(
        kernel,
        out_shape=jax.ShapeDtypeStruct((B, S, E), x.dtype),
        grid_spec=pltpu.PrefetchScalarGridSpec(
            num_scalar_prefetch=1,                          # key_lengths -> SMEM
            grid=(B // Bt,),
            in_specs=in_specs,
            out_specs=pl.BlockSpec((Bt, S, E), lambda b, L: (b, 0, 0)),
        ),
        compiler_params=pltpu.CompilerParams(
            # Batch steps are fully independent -> shard grid across TensorCores.
            dimension_semantics=("parallel",),
            # Raise the 16/32 MiB scoped-VMEM defaults; 64 MiB fits every TPU generation.
            vmem_limit_bytes=64 * 1024 * 1024,
        ),
    )(key_lengths.astype(jnp.int32), x,
      params["wq"], params["bq"], params["wk"], params["bk"],
      params["wv"], params["bv"], params["wo"], params["bo"],
      params["gamma"], params["beta"],
      params["w1"], params["b1"], params["w2"], params["b2"])


# ---------------- pure-JAX reference (mirrors the PyTorch forward) ----------
def reference_encoder_layer(x, mask, params, *, heads):
    B, S, E = x.shape
    D = E // heads

    def ln(v):
        mu = jnp.mean(v, axis=-1, keepdims=True)
        var = jnp.mean((v - mu) ** 2, axis=-1, keepdims=True)
        return params["gamma"][0] * (v - mu) * jax.lax.rsqrt(var + 1e-5) + params["beta"][0]

    q = x @ params["wq"] + params["bq"][0]
    k = x @ params["wk"] + params["bk"][0]
    v = x @ params["wv"] + params["bv"][0]
    q = q.reshape(B, S, heads, D).transpose(0, 2, 1, 3)
    k = k.reshape(B, S, heads, D).transpose(0, 2, 1, 3)
    v = v.reshape(B, S, heads, D).transpose(0, 2, 1, 3)
    energy = jnp.einsum("bhqd,bhkd->bhqk", q, k) / jnp.sqrt(jnp.float32(D))
    energy = jnp.where(mask[:, None, :, :] == 0, -1e10, energy)
    attn = jax.nn.softmax(energy, axis=-1)
    o = jnp.einsum("bhqk,bhkd->bhqd", attn, v).transpose(0, 2, 1, 3).reshape(B, S, E)
    o = o @ params["wo"] + params["bo"][0]
    x1 = ln(x + o)
    h = jax.nn.relu(x1 @ params["w1"] + params["b1"][0])
    ff = h @ params["w2"] + params["b2"][0]
    return ln(x1 + ff)


if __name__ == "__main__":
    B, S, E, H, PF = 2, 8, 128, 4, 256   # lane-dense embed dim (E multiple of 128)

    key = jax.random.PRNGKey(0)
    ks = jax.random.split(key, 16)
    init = lambda k, shape, scale: (scale * jax.random.normal(k, shape)).astype(jnp.float32)

    params = {
        "wq": init(ks[0], (E, E), 0.05), "bq": init(ks[1], (1, E), 0.01),
        "wk": init(ks[2], (E, E), 0.05), "bk": init(ks[3], (1, E), 0.01),
        "wv": init(ks[4], (E, E), 0.05), "bv": init(ks[5], (1, E), 0.01),
        "wo": init(ks[6], (E, E), 0.05), "bo": init(ks[7], (1, E), 0.01),
        "gamma": jnp.ones((1, E), jnp.float32),
        "beta": jnp.zeros((1, E), jnp.float32),
        "w1": init(ks[8], (E, PF), 0.05), "b1": init(ks[9], (1, PF), 0.01),
        "w2": init(ks[10], (PF, E), 0.05), "b2": init(ks[11], (1, E), 0.01),
    }

    x = init(ks[12], (B, S, E), 1.0)
    # key-padding: batch 0 uses all 8 positions, batch 1 uses the first 6.
    lengths = jnp.array([S, 6], jnp.int32)
    key_mask = (jnp.arange(S)[None, :] < lengths[:, None])
    mask = jnp.broadcast_to(key_mask[:, None, :], (B, S, S)).astype(jnp.float32)  # ref only

    ref = reference_encoder_layer(x, mask, params, heads=H)

    # f32 path, one batch element per grid step ("parallel" across batch).
    out = encoder_layer(x, lengths, params, heads=H, batch_tile=1)
    out = jax.block_until_ready(out)
    assert out.shape == (B, S, E)
    assert jnp.allclose(out, ref, atol=1e-3, rtol=1e-3), "f32 mismatch vs pure-JAX reference"

    # bf16 path (half the DMA/VMEM, 2x MXU) with batch_tile=2 -> rows flattened to (2*S, E).
    x_bf = x.astype(jnp.bfloat16)
    params_bf = jax.tree_util.tree_map(lambda p: p.astype(jnp.bfloat16), params)
    out_bf = encoder_layer(x_bf, lengths, params_bf, heads=H, batch_tile=2)
    out_bf = jax.block_until_ready(out_bf)
    assert jnp.allclose(out_bf.astype(jnp.float32), ref, atol=1e-1, rtol=1e-1), \
        "bf16 mismatch vs pure-JAX reference"

    print("KERNEL_OK")
</pallas_src>

<mosaic_0001>
module attributes {stable_mosaic.version = 11 : i64} {
  func.func @encoder_layer_kernel(%arg0: i32, %arg1: memref<2xi32, #tpu.memory_space<smem>>, %arg2: memref<1x8x128xf32, #tpu.memory_space<vmem>>, %arg3: memref<128x128xf32, #tpu.memory_space<vmem>>, %arg4: memref<1x128xf32, #tpu.memory_space<vmem>>, %arg5: memref<128x128xf32, #tpu.memory_space<vmem>>, %arg6: memref<1x128xf32, #tpu.memory_space<vmem>>, %arg7: memref<128x128xf32, #tpu.memory_space<vmem>>, %arg8: memref<1x128xf32, #tpu.memory_space<vmem>>, %arg9: memref<128x128xf32, #tpu.memory_space<vmem>>, %arg10: memref<1x128xf32, #tpu.memory_space<vmem>>, %arg11: memref<1x128xf32, #tpu.memory_space<vmem>>, %arg12: memref<1x128xf32, #tpu.memory_space<vmem>>, %arg13: memref<128x256xf32, #tpu.memory_space<vmem>>, %arg14: memref<1x256xf32, #tpu.memory_space<vmem>>, %arg15: memref<256x128xf32, #tpu.memory_space<vmem>>, %arg16: memref<1x128xf32, #tpu.memory_space<vmem>>, %arg17: memref<1x8x128xf32, #tpu.memory_space<vmem>>) attributes {dimension_semantics = [#tpu.dimension_semantics<parallel>], iteration_bounds = array<i64: 2>, scalar_prefetch = 1 : i64, scratch_operands = 0 : i64, tpu.core_type = #tpu.core_type<tc>, window_params = [{transform_indices = @transform_0, window_bounds = array<i64: 1, 8, 128>}, {pipeline_mode = #tpu.pipeline_mode<synchronous>, transform_indices = @transform_1, window_bounds = array<i64: 128, 128>}, {pipeline_mode = #tpu.pipeline_mode<synchronous>, transform_indices = @transform_2, window_bounds = array<i64: 1, 128>}, {pipeline_mode = #tpu.pipeline_mode<synchronous>, transform_indices = @transform_3, window_bounds = array<i64: 128, 128>}, {pipeline_mode = #tpu.pipeline_mode<synchronous>, transform_indices = @transform_4, window_bounds = array<i64: 1, 128>}, {pipeline_mode = #tpu.pipeline_mode<synchronous>, transform_indices = @transform_5, window_bounds = array<i64: 128, 128>}, {pipeline_mode = #tpu.pipeline_mode<synchronous>, transform_indices = @transform_6, window_bounds = array<i64: 1, 128>}, {pipeline_mode = #tpu.pipeline_mode<synchronous>, transform_indices = @transform_7, window_bounds = array<i64: 128, 128>}, {pipeline_mode = #tpu.pipeline_mode<synchronous>, transform_indices = @transform_8, window_bounds = array<i64: 1, 128>}, {pipeline_mode = #tpu.pipeline_mode<synchronous>, transform_indices = @transform_9, window_bounds = array<i64: 1, 128>}, {pipeline_mode = #tpu.pipeline_mode<synchronous>, transform_indices = @transform_10, window_bounds = array<i64: 1, 128>}, {pipeline_mode = #tpu.pipeline_mode<synchronous>, transform_indices = @transform_11, window_bounds = array<i64: 128, 256>}, {pipeline_mode = #tpu.pipeline_mode<synchronous>, transform_indices = @transform_12, window_bounds = array<i64: 1, 256>}, {pipeline_mode = #tpu.pipeline_mode<synchronous>, transform_indices = @transform_13, window_bounds = array<i64: 256, 128>}, {pipeline_mode = #tpu.pipeline_mode<synchronous>, transform_indices = @transform_14, window_bounds = array<i64: 1, 128>}, {transform_indices = @transform_15, window_bounds = array<i64: 1, 8, 128>}]} {
    %c1_i32 = arith.constant 1 : i32
    %0 = arith.muli %arg0, %c1_i32 : i32
    %c0 = arith.constant 0 : index
    %c0_0 = arith.constant 0 : index
    %c0_1 = arith.constant 0 : index
    %1 = vector.load %arg2[%c0, %c0_0, %c0_1] : memref<1x8x128xf32, #tpu.memory_space<vmem>>, vector<1x8x128xf32>
    %2 = vector.shape_cast %1 : vector<1x8x128xf32> to vector<8x128xf32>
    %c0_2 = arith.constant 0 : index
    %c0_3 = arith.constant 0 : index
    %3 = vector.load %arg3[%c0_2, %c0_3] : memref<128x128xf32, #tpu.memory_space<vmem>>, vector<128x128xf32>
    %cst = arith.constant dense<0.000000e+00> : vector<8x128xf32>
    %4 = tpu.matmul %2, %3, %cst {dimension_numbers = #tpu.dot_dimension_numbers<[1], [0], [0], [1], [0, 0, 1, 1], [], []>} : vector<8x128xf32>, vector<128x128xf32>, vector<8x128xf32> -> vector<8x128xf32>
    %c0_4 = arith.constant 0 : index
    %c0_5 = arith.constant 0 : index
    %5 = vector.load %arg4[%c0_4, %c0_5] : memref<1x128xf32, #tpu.memory_space<vmem>>, vector<1x128xf32>
    %6 = vector.broadcast %5 : vector<1x128xf32> to vector<8x128xf32>
    %7 = arith.addf %4, %6 : vector<8x128xf32>
    %cst_6 = arith.constant 0.176776692 : f32
    %8 = vector.broadcast %cst_6 : f32 to vector<8x128xf32>
    %9 = arith.mulf %7, %8 : vector<8x128xf32>
    %c0_7 = arith.constant 0 : index
    %c0_8 = arith.constant 0 : index
    %10 = vector.load %arg5[%c0_7, %c0_8] : memref<128x128xf32, #tpu.memory_space<vmem>>, vector<128x128xf32>
    %cst_9 = arith.constant dense<0.000000e+00> : vector<8x128xf32>
    %11 = tpu.matmul %2, %10, %cst_9 {dimension_numbers = #tpu.dot_dimension_numbers<[1], [0], [0], [1], [0, 0, 1, 1], [], []>} : vector<8x128xf32>, vector<128x128xf32>, vector<8x128xf32> -> vector<8x128xf32>
    %c0_10 = arith.constant 0 : index
    %c0_11 = arith.constant 0 : index
    %12 = vector.load %arg6[%c0_10, %c0_11] : memref<1x128xf32, #tpu.memory_space<vmem>>, vector<1x128xf32>
    %13 = vector.broadcast %12 : vector<1x128xf32> to vector<8x128xf32>
    %14 = arith.addf %11, %13 : vector<8x128xf32>
    %c0_12 = arith.constant 0 : index
    %c0_13 = arith.constant 0 : index
    %15 = vector.load %arg7[%c0_12, %c0_13] : memref<128x128xf32, #tpu.memory_space<vmem>>, vector<128x128xf32>
    %cst_14 = arith.constant dense<0.000000e+00> : vector<8x128xf32>
    %16 = tpu.matmul %2, %15, %cst_14 {dimension_numbers = #tpu.dot_dimension_numbers<[1], [0], [0], [1], [0, 0, 1, 1], [], []>} : vector<8x128xf32>, vector<128x128xf32>, vector<8x128xf32> -> vector<8x128xf32>
    %c0_15 = arith.constant 0 : index
    %c0_16 = arith.constant 0 : index
    %17 = vector.load %arg8[%c0_15, %c0_16] : memref<1x128xf32, #tpu.memory_space<vmem>>, vector<1x128xf32>
    %18 = vector.broadcast %17 : vector<1x128xf32> to vector<8x128xf32>
    %19 = arith.addf %16, %18 : vector<8x128xf32>
    %20 = tpu.iota {dimensions = array<i32: 1>} : vector<8x8xi32>
    %c0_i32 = arith.constant 0 : i32
    %21 = arith.addi %0, %c0_i32 : i32
    %22 = arith.index_cast %21 : i32 to index
    %23 = memref.load %arg1[%22] : memref<2xi32, #tpu.memory_space<smem>>
    %24 = vector.broadcast %23 : i32 to vector<8x8xi32>
    %25 = arith.cmpi slt, %20, %24 : vector<8x8xi32>
    %c0_17 = arith.constant 0 : index
    %c0_18 = arith.constant 0 : index
    %26 = vector.load %arg10[%c0_17, %c0_18] : memref<1x128xf32, #tpu.memory_space<vmem>>, vector<1x128xf32>
    %27 = vector.extract_strided_slice %9 {offsets = [0, 0], sizes = [8, 32], strides = [1, 1]} : vector<8x128xf32> to vector<8x32xf32>
    %28 = vector.extract_strided_slice %14 {offsets = [0, 0], sizes = [8, 32], strides = [1, 1]} : vector<8x128xf32> to vector<8x32xf32>
    %29 = vector.extract_strided_slice %19 {offsets = [0, 0], sizes = [8, 32], strides = [1, 1]} : vector<8x128xf32> to vector<8x32xf32>
    %cst_19 = arith.constant dense<0.000000e+00> : vector<8x8xf32>
    %30 = tpu.matmul %27, %28, %cst_19 {dimension_numbers = #tpu.dot_dimension_numbers<[1], [1], [0], [0], [0, 0, 1, 0], [], []>} : vector<8x32xf32>, vector<8x32xf32>, vector<8x8xf32> -> vector<8x8xf32>
    %cst_20 = arith.constant -1.000000e+10 : f32
    %31 = vector.broadcast %cst_20 : f32 to vector<8x8xf32>
    %32 = arith.select %25, %30, %31 : vector<8x8xi1>, vector<8x8xf32>
    %cst_21 = arith.constant dense<0xFF800000> : vector<8xf32>
    %33 = vector.multi_reduction <maximumf>, %32, %cst_21 [1] : vector<8x8xf32> to vector<8xf32>
    %34 = vector.shape_cast %33 : vector<8xf32> to vector<8x1xf32>
    %35 = vector.broadcast %34 : vector<8x1xf32> to vector<8x8xf32>
    %36 = arith.subf %32, %35 : vector<8x8xf32>
    %37 = math.exp %36 : vector<8x8xf32>
    %cst_22 = arith.constant dense<0.000000e+00> : vector<8xf32>
    %38 = vector.multi_reduction <add>, %37, %cst_22 [1] : vector<8x8xf32> to vector<8xf32>
    %39 = vector.shape_cast %38 : vector<8xf32> to vector<8x1xf32>
    %cst_23 = arith.constant dense<0.000000e+00> : vector<8x32xf32>
    %40 = tpu.matmul %37, %29, %cst_23 {dimension_numbers = #tpu.dot_dimension_numbers<[1], [0], [0], [1], [0, 0, 1, 1], [], []>} : vector<8x8xf32>, vector<8x32xf32>, vector<8x32xf32> -> vector<8x32xf32>
    %41 = tpu.reciprocal %39 : vector<8x1xf32> -> vector<8x1xf32>
    %42 = vector.broadcast %41 : vector<8x1xf32> to vector<8x32xf32>
    %43 = arith.mulf %40, %42 : vector<8x32xf32>
    %c0_24 = arith.constant 0 : index
    %c0_25 = arith.constant 0 : index
    %44 = vector.load %arg9[%c0_24, %c0_25] : memref<128x128xf32, #tpu.memory_space<vmem>>, vector<32x128xf32>
    %cst_26 = arith.constant dense<0.000000e+00> : vector<8x128xf32>
    %45 = tpu.matmul %43, %44, %cst_26 {dimension_numbers = #tpu.dot_dimension_numbers<[1], [0], [0], [1], [0, 0, 1, 1], [], []>} : vector<8x32xf32>, vector<32x128xf32>, vector<8x128xf32> -> vector<8x128xf32>
    %46 = vector.broadcast %26 : vector<1x128xf32> to vector<8x128xf32>
    %47 = arith.addf %46, %45 : vector<8x128xf32>
    %48 = vector.extract_strided_slice %9 {offsets = [0, 32], sizes = [8, 32], strides = [1, 1]} : vector<8x128xf32> to vector<8x32xf32>
    %49 = vector.extract_strided_slice %14 {offsets = [0, 32], sizes = [8, 32], strides = [1, 1]} : vector<8x128xf32> to vector<8x32xf32>
    %50 = vector.extract_strided_slice %19 {offsets = [0, 32], sizes = [8, 32], strides = [1, 1]} : vector<8x128xf32> to vector<8x32xf32>
    %cst_27 = arith.constant dense<0.000000e+00> : vector<8x8xf32>
    %51 = tpu.matmul %48, %49, %cst_27 {dimension_numbers = #tpu.dot_dimension_numbers<[1], [1], [0], [0], [0, 0, 1, 0], [], []>} : vector<8x32xf32>, vector<8x32xf32>, vector<8x8xf32> -> vector<8x8xf32>
    %cst_28 = arith.constant -1.000000e+10 : f32
    %52 = vector.broadcast %cst_28 : f32 to vector<8x8xf32>
    %53 = arith.select %25, %51, %52 : vector<8x8xi1>, vector<8x8xf32>
    %cst_29 = arith.constant dense<0xFF800000> : vector<8xf32>
    %54 = vector.multi_reduction <maximumf>, %53, %cst_29 [1] : vector<8x8xf32> to vector<8xf32>
    %55 = vector.shape_cast %54 : vector<8xf32> to vector<8x1xf32>
    %56 = vector.broadcast %55 : vector<8x1xf32> to vector<8x8xf32>
    %57 = arith.subf %53, %56 : vector<8x8xf32>
    %58 = math.exp %57 : vector<8x8xf32>
    %cst_30 = arith.constant dense<0.000000e+00> : vector<8xf32>
    %59 = vector.multi_reduction <add>, %58, %cst_30 [1] : vector<8x8xf32> to vector<8xf32>
    %60 = vector.shape_cast %59 : vector<8xf32> to vector<8x1xf32>
    %cst_31 = arith.constant dense<0.000000e+00> : vector<8x32xf32>
    %61 = tpu.matmul %58, %50, %cst_31 {dimension_numbers = #tpu.dot_dimension_numbers<[1], [0], [0], [1], [0, 0, 1, 1], [], []>} : vector<8x8xf32>, vector<8x32xf32>, vector<8x32xf32> -> vector<8x32xf32>
    %62 = tpu.reciprocal %60 : vector<8x1xf32> -> vector<8x1xf32>
    %63 = vector.broadcast %62 : vector<8x1xf32> to vector<8x32xf32>
    %64 = arith.mulf %61, %63 : vector<8x32xf32>
    %c32 = arith.constant 32 : index
    %c0_32 = arith.constant 0 : index
    %65 = vector.load %arg9[%c32, %c0_32] : memref<128x128xf32, #tpu.memory_space<vmem>>, vector<32x128xf32>
    %cst_33 = arith.constant dense<0.000000e+00> : vector<8x128xf32>
    %66 = tpu.matmul %64, %65, %cst_33 {dimension_numbers = #tpu.dot_dimension_numbers<[1], [0], [0], [1], [0, 0, 1, 1], [], []>} : vector<8x32xf32>, vector<32x128xf32>, vector<8x128xf32> -> vector<8x128xf32>
    %67 = arith.addf %47, %66 : vector<8x128xf32>
    %68 = vector.extract_strided_slice %9 {offsets = [0, 64], sizes = [8, 32], strides = [1, 1]} : vector<8x128xf32> to vector<8x32xf32>
    %69 = vector.extract_strided_slice %14 {offsets = [0, 64], sizes = [8, 32], strides = [1, 1]} : vector<8x128xf32> to vector<8x32xf32>
    %70 = vector.extract_strided_slice %19 {offsets = [0, 64], sizes = [8, 32], strides = [1, 1]} : vector<8x128xf32> to vector<8x32xf32>
    %cst_34 = arith.constant dense<0.000000e+00> : vector<8x8xf32>
    %71 = tpu.matmul %68, %69, %cst_34 {dimension_numbers = #tpu.dot_dimension_numbers<[1], [1], [0], [0], [0, 0, 1, 0], [], []>} : vector<8x32xf32>, vector<8x32xf32>, vector<8x8xf32> -> vector<8x8xf32>
    %cst_35 = arith.constant -1.000000e+10 : f32
    %72 = vector.broadcast %cst_35 : f32 to vector<8x8xf32>
    %73 = arith.select %25, %71, %72 : vector<8x8xi1>, vector<8x8xf32>
    %cst_36 = arith.constant dense<0xFF800000> : vector<8xf32>
    %74 = vector.multi_reduction <maximumf>, %73, %cst_36 [1] : vector<8x8xf32> to vector<8xf32>
    %75 = vector.shape_cast %74 : vector<8xf32> to vector<8x1xf32>
    %76 = vector.broadcast %75 : vector<8x1xf32> to vector<8x8xf32>
    %77 = arith.subf %73, %76 : vector<8x8xf32>
    %78 = math.exp %77 : vector<8x8xf32>
    %cst_37 = arith.constant dense<0.000000e+00> : vector<8xf32>
    %79 = vector.multi_reduction <add>, %78, %cst_37 [1] : vector<8x8xf32> to vector<8xf32>
    %80 = vector.shape_cast %79 : vector<8xf32> to vector<8x1xf32>
    %cst_38 = arith.constant dense<0.000000e+00> : vector<8x32xf32>
    %81 = tpu.matmul %78, %70, %cst_38 {dimension_numbers = #tpu.dot_dimension_numbers<[1], [0], [0], [1], [0, 0, 1, 1], [], []>} : vector<8x8xf32>, vector<8x32xf32>, vector<8x32xf32> -> vector<8x32xf32>
    %82 = tpu.reciprocal %80 : vector<8x1xf32> -> vector<8x1xf32>
    %83 = vector.broadcast %82 : vector<8x1xf32> to vector<8x32xf32>
    %84 = arith.mulf %81, %83 : vector<8x32xf32>
    %c64 = arith.constant 64 : index
    %c0_39 = arith.constant 0 : index
    %85 = vector.load %arg9[%c64, %c0_39] : memref<128x128xf32, #tpu.memory_space<vmem>>, vector<32x128xf32>
    %cst_40 = arith.constant dense<0.000000e+00> : vector<8x128xf32>
    %86 = tpu.matmul %84, %85, %cst_40 {dimension_numbers = #tpu.dot_dimension_numbers<[1], [0], [0], [1], [0, 0, 1, 1], [], []>} : vector<8x32xf32>, vector<32x128xf32>, vector<8x128xf32> -> vector<8x128xf32>
    %87 = arith.addf %67, %86 : vector<8x128xf32>
    %88 = vector.extract_strided_slice %9 {offsets = [0, 96], sizes = [8, 32], strides = [1, 1]} : vector<8x128xf32> to vector<8x32xf32>
    %89 = vector.extract_strided_slice %14 {offsets = [0, 96], sizes = [8, 32], strides = [1, 1]} : vector<8x128xf32> to vector<8x32xf32>
    %90 = vector.extract_strided_slice %19 {offsets = [0, 96], sizes = [8, 32], strides = [1, 1]} : vector<8x128xf32> to vector<8x32xf32>
    %cst_41 = arith.constant dense<0.000000e+00> : vector<8x8xf32>
    %91 = tpu.matmul %88, %89, %cst_41 {dimension_numbers = #tpu.dot_dimension_numbers<[1], [1], [0], [0], [0, 0, 1, 0], [], []>} : vector<8x32xf32>, vector<8x32xf32>, vector<8x8xf32> -> vector<8x8xf32>
    %cst_42 = arith.constant -1.000000e+10 : f32
    %92 = vector.broadcast %cst_42 : f32 to vector<8x8xf32>
    %93 = arith.select %25, %91, %92 : vector<8x8xi1>, vector<8x8xf32>
    %cst_43 = arith.constant dense<0xFF800000> : vector<8xf32>
    %94 = vector.multi_reduction <maximumf>, %93, %cst_43 [1] : vector<8x8xf32> to vector<8xf32>
    %95 = vector.shape_cast %94 : vector<8xf32> to vector<8x1xf32>
    %96 = vector.broadcast %95 : vector<8x1xf32> to vector<8x8xf32>
    %97 = arith.subf %93, %96 : vector<8x8xf32>
    %98 = math.exp %97 : vector<8x8xf32>
    %cst_44 = arith.constant dense<0.000000e+00> : vector<8xf32>
    %99 = vector.multi_reduction <add>, %98, %cst_44 [1] : vector<8x8xf32> to vector<8xf32>
    %100 = vector.shape_cast %99 : vector<8xf32> to vector<8x1xf32>
    %cst_45 = arith.constant dense<0.000000e+00> : vector<8x32xf32>
    %101 = tpu.matmul %98, %90, %cst_45 {dimension_numbers = #tpu.dot_dimension_numbers<[1], [0], [0], [1], [0, 0, 1, 1], [], []>} : vector<8x8xf32>, vector<8x32xf32>, vector<8x32xf32> -> vector<8x32xf32>
    %102 = tpu.reciprocal %100 : vector<8x1xf32> -> vector<8x1xf32>
    %103 = vector.broadcast %102 : vector<8x1xf32> to vector<8x32xf32>
    %104 = arith.mulf %101, %103 : vector<8x32xf32>
    %c96 = arith.constant 96 : index
    %c0_46 = arith.constant 0 : index
    %105 = vector.load %arg9[%c96, %c0_46] : memref<128x128xf32, #tpu.memory_space<vmem>>, vector<32x128xf32>
    %cst_47 = arith.constant dense<0.000000e+00> : vector<8x128xf32>
    %106 = tpu.matmul %104, %105, %cst_47 {dimension_numbers = #tpu.dot_dimension_numbers<[1], [0], [0], [1], [0, 0, 1, 1], [], []>} : vector<8x32xf32>, vector<32x128xf32>, vector<8x128xf32> -> vector<8x128xf32>
    %107 = arith.addf %87, %106 : vector<8x128xf32>
    %c0_48 = arith.constant 0 : index
    %c0_49 = arith.constant 0 : index
    %108 = vector.load %arg11[%c0_48, %c0_49] : memref<1x128xf32, #tpu.memory_space<vmem>>, vector<1x128xf32>
    %c0_50 = arith.constant 0 : index
    %c0_51 = arith.constant 0 : index
    %109 = vector.load %arg12[%c0_50, %c0_51] : memref<1x128xf32, #tpu.memory_space<vmem>>, vector<1x128xf32>
    %110 = arith.addf %2, %107 : vector<8x128xf32>
    %cst_52 = arith.constant dense<0.000000e+00> : vector<8xf32>
    %111 = vector.multi_reduction <add>, %110, %cst_52 [1] : vector<8x128xf32> to vector<8xf32>
    %112 = vector.shape_cast %111 : vector<8xf32> to vector<8x1xf32>
    %cst_53 = arith.constant 1.280000e+02 : f32
    %113 = vector.broadcast %cst_53 : f32 to vector<8x1xf32>
    %114 = arith.divf %112, %113 : vector<8x1xf32>
    %115 = vector.broadcast %114 : vector<8x1xf32> to vector<8x128xf32>
    %116 = arith.subf %110, %115 : vector<8x128xf32>
    %117 = arith.mulf %116, %116 : vector<8x128xf32>
    %cst_54 = arith.constant dense<0.000000e+00> : vector<8xf32>
    %118 = vector.multi_reduction <add>, %117, %cst_54 [1] : vector<8x128xf32> to vector<8xf32>
    %119 = vector.shape_cast %118 : vector<8xf32> to vector<8x1xf32>
    %cst_55 = arith.constant 1.280000e+02 : f32
    %120 = vector.broadcast %cst_55 : f32 to vector<8x1xf32>
    %121 = arith.divf %119, %120 : vector<8x1xf32>
    %122 = vector.broadcast %114 : vector<8x1xf32> to vector<8x128xf32>
    %123 = arith.subf %110, %122 : vector<8x128xf32>
    %124 = vector.broadcast %108 : vector<1x128xf32> to vector<8x128xf32>
    %125 = arith.mulf %124, %123 : vector<8x128xf32>
    %cst_56 = arith.constant 9.99999974E-6 : f32
    %126 = vector.broadcast %cst_56 : f32 to vector<8x1xf32>
    %127 = arith.addf %121, %126 : vector<8x1xf32>
    %128 = math.rsqrt %127 : vector<8x1xf32>
    %129 = vector.broadcast %128 : vector<8x1xf32> to vector<8x128xf32>
    %130 = arith.mulf %125, %129 : vector<8x128xf32>
    %131 = vector.broadcast %109 : vector<1x128xf32> to vector<8x128xf32>
    %132 = arith.addf %130, %131 : vector<8x128xf32>
    %c0_57 = arith.constant 0 : index
    %c0_58 = arith.constant 0 : index
    %133 = vector.load %arg13[%c0_57, %c0_58] : memref<128x256xf32, #tpu.memory_space<vmem>>, vector<128x256xf32>
    %cst_59 = arith.constant dense<0.000000e+00> : vector<8x256xf32>
    %134 = tpu.matmul %132, %133, %cst_59 {dimension_numbers = #tpu.dot_dimension_numbers<[1], [0], [0], [1], [0, 0, 1, 1], [], []>} : vector<8x128xf32>, vector<128x256xf32>, vector<8x256xf32> -> vector<8x256xf32>
    %c0_60 = arith.constant 0 : index
    %c0_61 = arith.constant 0 : index
    %135 = vector.load %arg14[%c0_60, %c0_61] : memref<1x256xf32, #tpu.memory_space<vmem>>, vector<1x256xf32>
    %136 = vector.broadcast %135 : vector<1x256xf32> to vector<8x256xf32>
    %137 = arith.addf %134, %136 : vector<8x256xf32>
    %cst_62 = arith.constant 0.000000e+00 : f32
    %138 = vector.broadcast %cst_62 : f32 to vector<8x256xf32>
    %139 = arith.maximumf %137, %138 : vector<8x256xf32>
    %c0_63 = arith.constant 0 : index
    %c0_64 = arith.constant 0 : index
    %140 = vector.load %arg15[%c0_63, %c0_64] : memref<256x128xf32, #tpu.memory_space<vmem>>, vector<256x128xf32>
    %cst_65 = arith.constant dense<0.000000e+00> : vector<8x128xf32>
    %141 = tpu.matmul %139, %140, %cst_65 {dimension_numbers = #tpu.dot_dimension_numbers<[1], [0], [0], [1], [0, 0, 1, 1], [], []>} : vector<8x256xf32>, vector<256x128xf32>, vector<8x128xf32> -> vector<8x128xf32>
    %c0_66 = arith.constant 0 : index
    %c0_67 = arith.constant 0 : index
    %142 = vector.load %arg16[%c0_66, %c0_67] : memref<1x128xf32, #tpu.memory_space<vmem>>, vector<1x128xf32>
    %143 = vector.broadcast %142 : vector<1x128xf32> to vector<8x128xf32>
    %144 = arith.addf %141, %143 : vector<8x128xf32>
    %145 = arith.addf %132, %144 : vector<8x128xf32>
    %cst_68 = arith.constant dense<0.000000e+00> : vector<8xf32>
    %146 = vector.multi_reduction <add>, %145, %cst_68 [1] : vector<8x128xf32> to vector<8xf32>
    %147 = vector.shape_cast %146 : vector<8xf32> to vector<8x1xf32>
    %cst_69 = arith.constant 1.280000e+02 : f32
    %148 = vector.broadcast %cst_69 : f32 to vector<8x1xf32>
    %149 = arith.divf %147, %148 : vector<8x1xf32>
    %150 = vector.broadcast %149 : vector<8x1xf32> to vector<8x128xf32>
    %151 = arith.subf %145, %150 : vector<8x128xf32>
    %152 = arith.mulf %151, %151 : vector<8x128xf32>
    %cst_70 = arith.constant dense<0.000000e+00> : vector<8xf32>
    %153 = vector.multi_reduction <add>, %152, %cst_70 [1] : vector<8x128xf32> to vector<8xf32>
    %154 = vector.shape_cast %153 : vector<8xf32> to vector<8x1xf32>
    %cst_71 = arith.constant 1.280000e+02 : f32
    %155 = vector.broadcast %cst_71 : f32 to vector<8x1xf32>
    %156 = arith.divf %154, %155 : vector<8x1xf32>
    %157 = vector.broadcast %149 : vector<8x1xf32> to vector<8x128xf32>
    %158 = arith.subf %145, %157 : vector<8x128xf32>
    %159 = vector.broadcast %108 : vector<1x128xf32> to vector<8x128xf32>
    %160 = arith.mulf %159, %158 : vector<8x128xf32>
    %cst_72 = arith.constant 9.99999974E-6 : f32
    %161 = vector.broadcast %cst_72 : f32 to vector<8x1xf32>
    %162 = arith.addf %156, %161 : vector<8x1xf32>
    %163 = math.rsqrt %162 : vector<8x1xf32>
    %164 = vector.broadcast %163 : vector<8x1xf32> to vector<8x128xf32>
    %165 = arith.mulf %160, %164 : vector<8x128xf32>
    %166 = vector.broadcast %109 : vector<1x128xf32> to vector<8x128xf32>
    %167 = arith.addf %165, %166 : vector<8x128xf32>
    %168 = vector.shape_cast %167 : vector<8x128xf32> to vector<1x8x128xf32>
    %c0_73 = arith.constant 0 : index
    %c0_74 = arith.constant 0 : index
    %c0_75 = arith.constant 0 : index
    %169 = vector.load %arg17[%c0_73, %c0_74, %c0_75] : memref<1x8x128xf32, #tpu.memory_space<vmem>>, vector<1x8x128xf32>
    tpu.vector_store %arg17[%c0_73, %c0_74, %c0_75], %168 {strides = array<i32>} : memref<1x8x128xf32, #tpu.memory_space<vmem>>, vector<1x8x128xf32>,
    return
  }
  func.func @transform_0(%arg0: i32, %arg1: memref<2xi32, #tpu.memory_space<smem>>) -> (i32, i32, i32) {
    %c0_i32 = arith.constant 0 : i32
    %c0_i32_0 = arith.constant 0 : i32
    %c0_i32_1 = arith.constant 0 : i32
    return %arg0, %c0_i32, %c0_i32_0 : i32, i32, i32
  }
  func.func @transform_1(%arg0: i32, %arg1: memref<2xi32, #tpu.memory_space<smem>>) -> (i32, i32) {
    %c0_i32 = arith.constant 0 : i32
    %c0_i32_0 = arith.constant 0 : i32
    %c0_i32_1 = arith.constant 0 : i32
    return %c0_i32, %c0_i32_0 : i32, i32
  }
  func.func @transform_2(%arg0: i32, %arg1: memref<2xi32, #tpu.memory_space<smem>>) -> (i32, i32) {
    %c0_i32 = arith.constant 0 : i32
    %c0_i32_0 = arith.constant 0 : i32
    %c0_i32_1 = arith.constant 0 : i32
    return %c0_i32, %c0_i32_0 : i32, i32
  }
  func.func @transform_3(%arg0: i32, %arg1: memref<2xi32, #tpu.memory_space<smem>>) -> (i32, i32) {
    %c0_i32 = arith.constant 0 : i32
    %c0_i32_0 = arith.constant 0 : i32
    %c0_i32_1 = arith.constant 0 : i32
    return %c0_i32, %c0_i32_0 : i32, i32
  }
  func.func @transform_4(%arg0: i32, %arg1: memref<2xi32, #tpu.memory_space<smem>>) -> (i32, i32) {
    %c0_i32 = arith.constant 0 : i32
    %c0_i32_0 = arith.constant 0 : i32
    %c0_i32_1 = arith.constant 0 : i32
    return %c0_i32, %c0_i32_0 : i32, i32
  }
  func.func @transform_5(%arg0: i32, %arg1: memref<2xi32, #tpu.memory_space<smem>>) -> (i32, i32) {
    %c0_i32 = arith.constant 0 : i32
    %c0_i32_0 = arith.constant 0 : i32
    %c0_i32_1 = arith.constant 0 : i32
    return %c0_i32, %c0_i32_0 : i32, i32
  }
  func.func @transform_6(%arg0: i32, %arg1: memref<2xi32, #tpu.memory_space<smem>>) -> (i32, i32) {
    %c0_i32 = arith.constant 0 : i32
    %c0_i32_0 = arith.constant 0 : i32
    %c0_i32_1 = arith.constant 0 : i32
    return %c0_i32, %c0_i32_0 : i32, i32
  }
  func.func @transform_7(%arg0: i32, %arg1: memref<2xi32, #tpu.memory_space<smem>>) -> (i32, i32) {
    %c0_i32 = arith.constant 0 : i32
    %c0_i32_0 = arith.constant 0 : i32
    %c0_i32_1 = arith.constant 0 : i32
    return %c0_i32, %c0_i32_0 : i32, i32
  }
  func.func @transform_8(%arg0: i32, %arg1: memref<2xi32, #tpu.memory_space<smem>>) -> (i32, i32) {
    %c0_i32 = arith.constant 0 : i32
    %c0_i32_0 = arith.constant 0 : i32
    %c0_i32_1 = arith.constant 0 : i32
    return %c0_i32, %c0_i32_0 : i32, i32
  }
  func.func @transform_9(%arg0: i32, %arg1: memref<2xi32, #tpu.memory_space<smem>>) -> (i32, i32) {
    %c0_i32 = arith.constant 0 : i32
    %c0_i32_0 = arith.constant 0 : i32
    %c0_i32_1 = arith.constant 0 : i32
    return %c0_i32, %c0_i32_0 : i32, i32
  }
  func.func @transform_10(%arg0: i32, %arg1: memref<2xi32, #tpu.memory_space<smem>>) -> (i32, i32) {
    %c0_i32 = arith.constant 0 : i32
    %c0_i32_0 = arith.constant 0 : i32
    %c0_i32_1 = arith.constant 0 : i32
    return %c0_i32, %c0_i32_0 : i32, i32
  }
  func.func @transform_11(%arg0: i32, %arg1: memref<2xi32, #tpu.memory_space<smem>>) -> (i32, i32) {
    %c0_i32 = arith.constant 0 : i32
    %c0_i32_0 = arith.constant 0 : i32
    %c0_i32_1 = arith.constant 0 : i32
    return %c0_i32, %c0_i32_0 : i32, i32
  }
  func.func @transform_12(%arg0: i32, %arg1: memref<2xi32, #tpu.memory_space<smem>>) -> (i32, i32) {
    %c0_i32 = arith.constant 0 : i32
    %c0_i32_0 = arith.constant 0 : i32
    %c0_i32_1 = arith.constant 0 : i32
    return %c0_i32, %c0_i32_0 : i32, i32
  }
  func.func @transform_13(%arg0: i32, %arg1: memref<2xi32, #tpu.memory_space<smem>>) -> (i32, i32) {
    %c0_i32 = arith.constant 0 : i32
    %c0_i32_0 = arith.constant 0 : i32
    %c0_i32_1 = arith.constant 0 : i32
    return %c0_i32, %c0_i32_0 : i32, i32
  }
  func.func @transform_14(%arg0: i32, %arg1: memref<2xi32, #tpu.memory_space<smem>>) -> (i32, i32) {
    %c0_i32 = arith.constant 0 : i32
    %c0_i32_0 = arith.constant 0 : i32
    %c0_i32_1 = arith.constant 0 : i32
    return %c0_i32, %c0_i32_0 : i32, i32
  }
  func.func @transform_15(%arg0: i32, %arg1: memref<2xi32, #tpu.memory_space<smem>>) -> (i32, i32, i32) {
    %c0_i32 = arith.constant 0 : i32
    %c0_i32_0 = arith.constant 0 : i32
    %c0_i32_1 = arith.constant 0 : i32
    return %arg0, %c0_i32, %c0_i32_0 : i32, i32, i32
  }
}

</mosaic_0001>

<bundles_post_ra>
// kernel: tpu_custom_call.1
= control target key start
LH: loop header
LB: loop body
LE: loop exit
PB: predicated region body
PF: predicated region fallthrough
CT: control target
= control target key end

     0   :  { %s4544_s0 = inlined_call_operand.hbm [shape: s32[2], index: 0, kind: input, shape index: {}]   ;;  %s4545_s1 = inlined_call_operand.hbm [shape: f32[2,8,128], index: 1, kind: input, shape index: {}]   ;;  %s4546_s2 = inlined_call_operand.hbm [shape: f32[128,128], index: 2, kind: input, shape index: {}]   ;;  %s4547_s3 = inlined_call_operand.hbm [shape: f32[1,128], index: 3, kind: input, shape index: {}]   ;;  %s4548_s4 = inlined_call_operand.hbm [shape: f32[128,128], index: 4, kind: input, shape index: {}]   ;;  %s4549_s5 = inlined_call_operand.hbm [shape: f32[1,128], index: 5, kind: input, shape index: {}]   ;;  %s4550_s6 = inlined_call_operand.hbm [shape: f32[128,128], index: 6, kind: input, shape index: {}]   ;;  %s4551_s7 = inlined_call_operand.hbm [shape: f32[1,128], index: 7, kind: input, shape index: {}]   ;;  %s4552_s8 = inlined_call_operand.hbm [shape: f32[128,128], index: 8, kind: input, shape index: {}]   ;;  %s4553_s9 = inlined_call_operand.hbm [shape: f32[1,128], index: 9, kind: input, shape index: {}]   ;;  %s4554_s10 = inlined_call_operand.hbm [shape: f32[1,128], index: 10, kind: input, shape index: {}]   ;;  %s4555_s11 = inlined_call_operand.hbm [shape: f32[1,128], index: 11, kind: input, shape index: {}]   ;;  %s4556_s12 = inlined_call_operand.hbm [shape: f32[128,256], index: 12, kind: input, shape index: {}]   ;;  %s4557_s13 = inlined_call_operand.hbm [shape: f32[1,256], index: 13, kind: input, shape index: {}]   ;;  %s4558_s14 = inlined_call_operand.hbm [shape: f32[256,128], index: 14, kind: input, shape index: {}]   ;;  %s4559_s15 = inlined_call_operand.hbm [shape: f32[1,128], index: 15, kind: input, shape index: {}]   ;;  %s4560_s16 = inlined_call_operand.hbm [shape: f32[2,8,128], index: 16, kind: output, shape index: {}]  }
   0x1   :  { %4574 = sst [smem:[#allocation44_spill]] %s4544_s0 }
   0x2   :  { %4575 = sst [smem:[#allocation45_spill]] %s4545_s1  ;;  %s4580_s23 = sld [smem:[#allocation44_spill]] }
   0x3   :  { %4576 = sst [smem:[#allocation46_spill]] %s4546_s2 }
   0x4   :  { %4577 = sst [smem:[#allocation47_spill]] %s4547_s3 }
   0x5   :  { %4578 = sst [smem:[#allocation48_spill]] %s4548_s4 }
   0x6   :  { %4579 = sst [smem:[#allocation49_spill]] %s4560_s16 }
   0x8   :  { %s3208_s1 = scalar_lea.hbm %s4580_s23, 16 }
   0x9   :  { %p3209_p0 = scmp.ne.s32.totalorder %s4580_s23, %s3208_s1  ;;  %p3212_p1 = scmp.lt.u32.totalorder %s3208_s1, %s4580_s23 }
   0xb   :  { %p3214_p2 = pnand %p3212_p1, %p3209_p0 }
   0xd   :  { %3217 = shalt.err (!%p3214_p2)  }
   0xe   :  { %s3738_s28 = smov [#allocation3]  }
   0xf   :  { %22 = dma.hbm_to_smem %s4580_s23, 16, %s3738_s28, [#allocation2] }
  0x10   :  { %3684 = dma.done.wait [#allocation2], 16 }
  0x11   :  { %3685 = vsyncadd [#allocation2], 4294967280 }
  0x12   :  { %24 = sfence }
  0x13   :  { %25 = vsyncpa [#allocation5], 0 }
  0x14   :  { %27 = vsyncpa [#allocation5 + $0x1], 0 }
  0x15   :  { %28 = vsyncpa [#allocation8], 0 }
  0x16   :  { %29 = vsyncpa [#allocation11], 0 }
  0x17   :  { %30 = vsyncpa [#allocation14], 0 }
  0x18   :  { %31 = vsyncpa [#allocation17], 0 }
  0x19   :  { %32 = vsyncpa [#allocation20], 0 }
  0x1a   :  { %33 = vsyncpa [#allocation23], 0 }
  0x1b   :  { %34 = vsyncpa [#allocation26], 0 }
  0x1c   :  { %35 = vsyncpa [#allocation6], 0 }
  0x1d   :  { %37 = vsyncpa [#allocation6 + $0x1], 0  ;;  %s3862_s1 = smov 0   ;;  %s3864_s0 = smov 0  }
  0x1e   :  { %s3866_s17 = smov 0   ;;  %s3868_s18 = smov 0  }
  0x1f LB: > { %4581 = sst [smem:[#allocation39_spill]] %s3724_s1  ;;  %s3739_s19 = smov [#allocation7]   ;;  %s3736_s18 = sphi %s3868_s18, %s4632_s18   ;;  %s3732_s17 = sphi %s3866_s17, %s4240_s17   ;;  %s3728_s0 = sphi %s3864_s0, %s4631_s0   ;;  %s3724_s1 = sphi %s3862_s1, %s4630_s1  }
  0x20   : > { %4582 = sst [smem:[#allocation40_spill]] %s3728_s0  ;;  %s406_s20 = sshll.u32 %s3739_s19, 4  ;;  %s3888_s20 = int_to_ptr.vmem [resolvable:$true] %s406_s20 }
  0x21   : > { %4583 = sst [smem:[#allocation41_spill]] %s3732_s17  ;;  %s3883_s21 = sadd.s32 4294967295, %s3736_s18  }
  0x22   : > { %4584 = sst [smem:[#allocation42_spill]] %s3883_s21  ;;  %p2457_p3 = scmp.ge.s32.totalorder %s3736_s18, 1 }
  0x23   : > { %p4570_p4 = scmp.eq.s32.totalorder %s3883_s21, 0  ;;  %p394_p5 = scmp.lt.s32.totalorder %s3736_s18, 3 }
  0x24   : > { %s3740_s23 = smov [#allocation10]   ;;  %s3741_s26 = smov [#allocation13]  }
  0x25   : > { %p3890_p6 = pnand %p2457_p3, %p394_p5  ;;  %s430_s24 = sshll.u32 %s3740_s23, 4  ;;  %s3903_s24 = int_to_ptr.vmem [resolvable:$true] %s430_s24 }
  0x26   : > { %s454_s27 = sshll.u32 %s3741_s26, 4  ;;  %s4588_s2 = sld [smem:[#allocation46_spill]]  ;;  %s3905_s27 = int_to_ptr.vmem [resolvable:$true] %s454_s27 }
  0x27   : > { %s4585_s22 = scalar_select %p3890_p6, 1, 0 }
  0x28   : > { %p3050_p8 = pneg %p3890_p6 }
  0x29   : > { %4586 = sst [smem:[#allocation43_spill]] %s4585_s22 }
  0x2a   : > { %p3899_p9 = pnand %p3050_p8, %p4570_p4 }
  0x2c   : > { %s3218_s30 = scalar_lea.hbm %s4588_s2, 2048  ;;  %p3915_p11 = pneg %p3899_p9 }
  0x2d   : > { %p3219_p10 = scmp.ne.s32.totalorder %s4588_s2, %s3218_s30  ;;  %p3225_p0 = scmp.lt.u32.totalorder %s3218_s30, %s4588_s2 }
  0x2f   : > { %p3221_p12 = pnand %p3915_p11, %p3219_p10 }
  0x31   : > { %p3222_p13 = pneg %p3221_p12 }
  0x33   : > { %p3227_p1 = pnand %p3225_p0, %p3222_p13 }
  0x35   : > { %3230 = shalt.err (!%p3227_p1)
}
  0x36   : > { %s3231_s16 = scalar_lea.vmem %s3888_s20, 2048  ;;  %p3239_p8 = scmp.lt.s32.totalorder %s3888_s20, %s3888_s20 }
  0x37   : > { %p3232_p2 = scmp.ne.s32.totalorder %s3888_s20, %s3231_s16  ;;  %p3240_p7 = scmp.lt.s32.totalorder %s3231_s16, %s3231_s16 }
  0x39   : > { %p3234_p3 = pnand %p3232_p2, %p3915_p11  ;;  %p3241_p10 = por %p3240_p7, %p3239_p8 }
  0x3b   : > { %p3235_p5 = pneg %p3234_p3 }
  0x3d   : > { %p3242_p12 = pnand %p3241_p10, %p3235_p5 }
  0x3f   : > { %3245 = shalt.err (!%p3242_p12)
}
  0x40   : > { %s4572_s28 = smov 128   ;;  %s3743_s22 = smov 8  }
  0x41   : > { %3053 = dma.hbm_to_vmem [thread:$0]  (!%p3899_p9), %s4588_s2, 2048, %s3888_s20, [#allocation8], %s4572_s28, %s4572_s28, %s3743_s22  }
  0x42   : > { %s4590_s4 = sld [smem:[#allocation48_spill]] }
  0x48   : > { %s3246_s16 = scalar_lea.hbm %s4590_s4, 2048 }
  0x49   : > { %p3247_p7 = scmp.ne.s32.totalorder %s4590_s4, %s3246_s16  ;;  %p3253_p1 = scmp.lt.u32.totalorder %s3246_s16, %s4590_s4 }
  0x4b   : > { %p3249_p13 = pnand %p3247_p7, %p3915_p11 }
  0x4d   : > { %p3250_p0 = pneg %p3249_p13 }
  0x4f   : > { %p3255_p2 = pnand %p3253_p1, %p3250_p0 }
  0x51   : > { %3258 = shalt.err (!%p3255_p2)
}
  0x52   : > { %s3259_s20 = scalar_lea.vmem %s3903_s24, 2048  ;;  %p3267_p10 = scmp.lt.s32.totalorder %s3903_s24, %s3903_s24 }
  0x53   : > { %p3260_p3 = scmp.ne.s32.totalorder %s3903_s24, %s3259_s20  ;;  %p3268_p12 = scmp.lt.s32.totalorder %s3259_s20, %s3259_s20 }
  0x55   : > { %p3262_p5 = pnand %p3260_p3, %p3915_p11  ;;  %p3269_p7 = por %p3268_p12, %p3267_p10 }
  0x57   : > { %p3263_p8 = pneg %p3262_p5 }
  0x59   : > { %p3270_p13 = pnand %p3269_p7, %p3263_p8 }
  0x5b   : > { %3273 = shalt.err (!%p3270_p13)
}
  0x5c   : > { %3059 = dma.hbm_to_vmem [thread:$0]  (!%p3899_p9), %s4590_s4, 2048, %s3903_s24, [#allocation11], %s4572_s28, %s4572_s28, %s3743_s22  }
  0x5d   : > { %s3274_s29 = scalar_lea.hbm %s4550_s6, 2048 }
  0x5e   : > { %p3275_p0 = scmp.ne.s32.totalorder %s4550_s6, %s3274_s29  ;;  %p3281_p3 = scmp.lt.u32.totalorder %s3274_s29, %s4550_s6 }
  0x60   : > { %p3277_p1 = pnand %p3275_p0, %p3915_p11 }
  0x62   : > { %p3278_p2 = pneg %p3277_p1 }
  0x64   : > { %p3283_p5 = pnand %p3281_p3, %p3278_p2 }
  0x66   : > { %3286 = shalt.err (!%p3283_p5)
}
  0x67   : > { %s3287_s24 = scalar_lea.vmem %s3905_s27, 2048  ;;  %p3295_p7 = scmp.lt.s32.totalorder %s3905_s27, %s3905_s27 }
  0x68   : > { %p3288_p8 = scmp.ne.s32.totalorder %s3905_s27, %s3287_s24  ;;  %p3296_p13 = scmp.lt.s32.totalorder %s3287_s24, %s3287_s24 }
  0x6a   : > { %p3290_p10 = pnand %p3288_p8, %p3915_p11  ;;  %p3297_p0 = por %p3296_p13, %p3295_p7 }
  0x6c   : > { %p3291_p12 = pneg %p3290_p10 }
  0x6e   : > { %p3298_p1 = pnand %p3297_p0, %p3291_p12 }
  0x70   : > { %3301 = shalt.err (!%p3298_p1)
}
  0x71   : > { %3065 = dma.hbm_to_vmem [thread:$0]  (!%p3899_p9), %s4550_s6, 2048, %s3905_s27, [#allocation14], %s4572_s28, %s4572_s28, %s3743_s22  }
  0x72   : > { %s3744_s0 = smov [#allocation16]   ;;  %s3745_s21 = smov [#allocation19]  }
  0x73   : > { %s478_s17 = sshll.u32 %s3744_s0, 4  ;;  %s503_s29 = sshll.u32 %s3745_s21, 4  ;;  %s479_s17 = int_to_ptr.vmem [resolvable:$true] %s478_s17  ;;  %s504_s29 = int_to_ptr.vmem [resolvable:$true] %s503_s29 }
  0x74   : > { %s3302_s26 = scalar_lea.hbm %s4552_s8, 2048 }
  0x75   : > { %p3303_p2 = scmp.ne.s32.totalorder %s4552_s8, %s3302_s26  ;;  %p3309_p8 = scmp.lt.u32.totalorder %s3302_s26, %s4552_s8 }
  0x77   : > { %p3305_p3 = pnand %p3303_p2, %p3915_p11 }
  0x79   : > { %p3306_p5 = pneg %p3305_p3 }
  0x7b   : > { %p3311_p10 = pnand %p3309_p8, %p3306_p5 }
  0x7d   : > { %3314 = shalt.err (!%p3311_p10)
}
  0x7e   : > { %s3315_s27 = scalar_lea.vmem %s479_s17, 2048  ;;  %p3323_p0 = scmp.lt.s32.totalorder %s479_s17, %s479_s17 }
  0x7f   : > { %p3316_p12 = scmp.ne.s32.totalorder %s479_s17, %s3315_s27  ;;  %p3324_p1 = scmp.lt.s32.totalorder %s3315_s27, %s3315_s27 }
  0x81   : > { %p3318_p7 = pnand %p3316_p12, %p3915_p11  ;;  %p3325_p4 = por %p3324_p1, %p3323_p0 }
  0x83   : > { %p3319_p13 = pneg %p3318_p7 }
  0x85   : > { %p3326_p6 = pnand %p3325_p4, %p3319_p13 }
  0x87   : > { %3329 = shalt.err (!%p3326_p6)
}
  0x88   : > { %3071 = dma.hbm_to_vmem [thread:$0]  (!%p3899_p9), %s4552_s8, 2048, %s479_s17, [#allocation17], %s4572_s28, %s4572_s28, %s3743_s22  }
  0x89   : > { %s3330_s30 = scalar_lea.hbm %s4554_s10, 16 }
  0x8a   : > { %p3331_p4 = scmp.ne.s32.totalorder %s4554_s10, %s3330_s30  ;;  %p3337_p3 = scmp.lt.u32.totalorder %s3330_s30, %s4554_s10 }
  0x8c   : > { %p3333_p6 = pnand %p3331_p4, %p3915_p11 }
  0x8e   : > { %p3334_p2 = pneg %p3333_p6 }
  0x90   : > { %p3339_p5 = pnand %p3337_p3, %p3334_p2 }
  0x92   : > { %3342 = shalt.err (!%p3339_p5)
}
  0x93   : > { %s3343_s20 = scalar_lea.vmem %s504_s29, 16  ;;  %s3350_s17 = scalar_lea.vmem %s504_s29, 32 }
  0x94   : > { %p3344_p8 = scmp.ne.s32.totalorder %s504_s29, %s3343_s20  ;;  %p3351_p7 = scmp.lt.s32.totalorder %s504_s29, %s504_s29 }
  0x95   : > { %p3352_p13 = scmp.lt.s32.totalorder %s3350_s17, %s3343_s20 }
  0x96   : > { %p3346_p10 = pnand %p3344_p8, %p3915_p11 }
  0x97   : > { %p3353_p0 = por %p3352_p13, %p3351_p7 }
  0x98   : > { %p3347_p12 = pneg %p3346_p10 }
  0x9a   : > { %p3354_p1 = pnand %p3353_p0, %p3347_p12 }
  0x9c   : > { %3357 = shalt.err (!%p3354_p1)
}
  0x9d   : > { %3077 = dma.hbm_to_vmem [thread:$0]  (!%p3899_p9), %s4554_s10, 16, %s504_s29, [#allocation20]  }
  0x9e   : > { %s3746_s1 = smov [#allocation22]   ;;  %s3358_s19 = scalar_lea.hbm %s4556_s12, 4096 }
  0x9f   : > { %s524_s0 = sshll.u32 %s3746_s1, 4  ;;  %p3359_p4 = scmp.ne.s32.totalorder %s4556_s12, %s3358_s19  ;;  %s525_s0 = int_to_ptr.vmem [resolvable:$true] %s524_s0 }
  0xa0   : > { %p3365_p3 = scmp.lt.u32.totalorder %s3358_s19, %s4556_s12 }
  0xa1   : > { %p3361_p6 = pnand %p3359_p4, %p3915_p11 }
  0xa3   : > { %p3362_p2 = pneg %p3361_p6 }
  0xa5   : > { %p3367_p5 = pnand %p3365_p3, %p3362_p2 }
  0xa7   : > { %3370 = shalt.err (!%p3367_p5)
}
  0xa8   : > { %s3371_s29 = scalar_lea.vmem %s525_s0, 4096  ;;  %p3379_p7 = scmp.lt.s32.totalorder %s525_s0, %s525_s0 }
  0xa9   : > { %p3372_p8 = scmp.ne.s32.totalorder %s525_s0, %s3371_s29  ;;  %p3380_p13 = scmp.lt.s32.totalorder %s3371_s29, %s3371_s29 }
  0xab   : > { %p3374_p10 = pnand %p3372_p8, %p3915_p11  ;;  %p3381_p0 = por %p3380_p13, %p3379_p7 }
  0xad   : > { %p3375_p12 = pneg %p3374_p10 }
  0xaf   : > { %p3382_p1 = pnand %p3381_p0, %p3375_p12 }
  0xb1   : > { %3385 = shalt.err (!%p3382_p1)
}
  0xb2   : > { %s3747_s17 = smov 256   ;;  %s3748_s27 = smov 16  }
  0xb3   : > { %3083 = dma.hbm_to_vmem [thread:$0]  (!%p3899_p9), %s4556_s12, 4096, %s525_s0, [#allocation23], %s3747_s17, %s3747_s17, %s3748_s27  }
  0xb4   : > { %s3749_s21 = smov [#allocation25]   ;;  %s3750_s19 = smov [#allocation9]  }
  0xb5   : > { %s548_s30 = sshll.u32 %s3749_s21, 4  ;;  %s420_s26 = sshll.u32 %s3750_s19, 4  ;;  %s549_s30 = int_to_ptr.vmem [resolvable:$true] %s548_s30  ;;  %s4048_s26 = int_to_ptr.vmem [resolvable:$true] %s420_s26 }
  0xb6   : > { %s3386_s20 = scalar_lea.hbm %s4558_s14, 4096 }
  0xb7   : > { %p3387_p4 = scmp.ne.s32.totalorder %s4558_s14, %s3386_s20  ;;  %p3393_p3 = scmp.lt.u32.totalorder %s3386_s20, %s4558_s14 }
  0xb9   : > { %p3389_p6 = pnand %p3387_p4, %p3915_p11 }
  0xbb   : > { %p3390_p2 = pneg %p3389_p6 }
  0xbd   : > { %p3395_p5 = pnand %p3393_p3, %p3390_p2 }
  0xbf   : > { %3398 = shalt.err (!%p3395_p5)
}
  0xc0   : > { %s3399_s17 = scalar_lea.vmem %s549_s30, 4096  ;;  %p3407_p7 = scmp.lt.s32.totalorder %s549_s30, %s549_s30 }
  0xc1   : > { %p3400_p8 = scmp.ne.s32.totalorder %s549_s30, %s3399_s17  ;;  %p3408_p13 = scmp.lt.s32.totalorder %s3399_s17, %s3399_s17 }
  0xc3   : > { %p3402_p10 = pnand %p3400_p8, %p3915_p11  ;;  %p3409_p0 = por %p3408_p13, %p3407_p7 }
  0xc5   : > { %p3403_p12 = pneg %p3402_p10 }
  0xc7   : > { %p3410_p1 = pnand %p3409_p0, %p3403_p12 }
  0xc9   : > { %3413 = shalt.err (!%p3410_p1)
}
  0xca   : > { %s4591_s28 = smov 128   ;;  %s4592_s3 = sld [smem:[#allocation47_spill]] }
  0xcb   : > { %3089 = dma.hbm_to_vmem [thread:$0]  (!%p3899_p9), %s4558_s14, 4096, %s549_s30, [#allocation26], %s4591_s28, %s4591_s28, %s3743_s22  }
  0xd0   : > { %s3414_s16 = scalar_lea.hbm %s4592_s3, 16 }
  0xd1   : > { %p3415_p4 = scmp.ne.s32.totalorder %s4592_s3, %s3414_s16  ;;  %p3421_p3 = scmp.lt.u32.totalorder %s3414_s16, %s4592_s3 }
  0xd3   : > { %p3417_p6 = pnand %p3415_p4, %p3915_p11 }
  0xd5   : > { %p3418_p2 = pneg %p3417_p6 }
  0xd7   : > { %p3423_p5 = pnand %p3421_p3, %p3418_p2 }
  0xd9   : > { %3426 = shalt.err (!%p3423_p5)
}
  0xda   : > { %s3427_s22 = scalar_lea.vmem %s4048_s26, 16  ;;  %s3434_s30 = scalar_lea.vmem %s4048_s26, 32 }
  0xdb   : > { %p3428_p8 = scmp.ne.s32.totalorder %s4048_s26, %s3427_s22  ;;  %p3435_p7 = scmp.lt.s32.totalorder %s4048_s26, %s4048_s26 }
  0xdc   : > { %p3436_p13 = scmp.lt.s32.totalorder %s3434_s30, %s3427_s22 }
  0xdd   : > { %p3430_p10 = pnand %p3428_p8, %p3915_p11 }
  0xde   : > { %p3437_p0 = por %p3436_p13, %p3435_p7 }
  0xdf   : > { %p3431_p12 = pneg %p3430_p10 }
  0xe1   : > { %p3438_p1 = pnand %p3437_p0, %p3431_p12 }
  0xe3   : > { %3441 = shalt.err (!%p3438_p1)
}
  0xe4   : > { %3056 = dma.hbm_to_vmem [thread:$0]  (!%p3899_p9), %s4592_s3, 16, %s4048_s26, [#allocation8]  }
  0xe5   : > { %s3751_s28 = smov [#allocation12]   ;;  %s3752_s1 = smov [#allocation15]  }
  0xe6   : > { %s444_s27 = sshll.u32 %s3751_s28, 4  ;;  %s468_s21 = sshll.u32 %s3752_s1, 4  ;;  %s445_s27 = int_to_ptr.vmem [resolvable:$true] %s444_s27  ;;  %s4095_s21 = int_to_ptr.vmem [resolvable:$true] %s468_s21 }
  0xe7   : > { %s3442_s24 = scalar_lea.hbm %s4549_s5, 16 }
  0xe8   : > { %p3443_p4 = scmp.ne.s32.totalorder %s4549_s5, %s3442_s24  ;;  %p3449_p3 = scmp.lt.u32.totalorder %s3442_s24, %s4549_s5 }
  0xea   : > { %p3445_p6 = pnand %p3443_p4, %p3915_p11 }
  0xec   : > { %p3446_p2 = pneg %p3445_p6 }
  0xee   : > { %p3451_p5 = pnand %p3449_p3, %p3446_p2 }
  0xf0   : > { %3454 = shalt.err (!%p3451_p5)
}
  0xf1   : > { %s3455_s22 = scalar_lea.vmem %s445_s27, 16  ;;  %s3462_s30 = scalar_lea.vmem %s445_s27, 32 }
  0xf2   : > { %p3456_p8 = scmp.ne.s32.totalorder %s445_s27, %s3455_s22  ;;  %p3463_p7 = scmp.lt.s32.totalorder %s445_s27, %s445_s27 }
  0xf3   : > { %p3464_p13 = scmp.lt.s32.totalorder %s3462_s30, %s3455_s22 }
  0xf4   : > { %p3458_p10 = pnand %p3456_p8, %p3915_p11 }
  0xf5   : > { %p3465_p0 = por %p3464_p13, %p3463_p7 }
  0xf6   : > { %p3459_p12 = pneg %p3458_p10 }
  0xf8   : > { %p3466_p1 = pnand %p3465_p0, %p3459_p12 }
  0xfa   : > { %3469 = shalt.err (!%p3466_p1)
}
  0xfb   : > { %3062 = dma.hbm_to_vmem [thread:$0]  (!%p3899_p9), %s4549_s5, 16, %s445_s27, [#allocation11]  }
  0xfc   : > { %s3470_s19 = scalar_lea.hbm %s4551_s7, 16 }
  0xfd   : > { %p3471_p4 = scmp.ne.s32.totalorder %s4551_s7, %s3470_s19  ;;  %p3477_p3 = scmp.lt.u32.totalorder %s3470_s19, %s4551_s7 }
  0xff   : > { %p3473_p6 = pnand %p3471_p4, %p3915_p11 }
 0x101   : > { %p3474_p2 = pneg %p3473_p6 }
 0x103   : > { %p3479_p5 = pnand %p3477_p3, %p3474_p2 }
 0x105   : > { %3482 = shalt.err (!%p3479_p5)
}
 0x106   : > { %s3483_s27 = scalar_lea.vmem %s4095_s21, 16  ;;  %s3490_s2 = scalar_lea.vmem %s4095_s21, 32 }
 0x107   : > { %p3484_p8 = scmp.ne.s32.totalorder %s4095_s21, %s3483_s27  ;;  %p3491_p7 = scmp.lt.s32.totalorder %s4095_s21, %s4095_s21 }
 0x108   : > { %p3492_p13 = scmp.lt.s32.totalorder %s3490_s2, %s3483_s27 }
 0x109   : > { %p3486_p10 = pnand %p3484_p8, %p3915_p11 }
 0x10a   : > { %p3493_p0 = por %p3492_p13, %p3491_p7 }
 0x10b   : > { %p3487_p12 = pneg %p3486_p10 }
 0x10d   : > { %p3494_p1 = pnand %p3493_p0, %p3487_p12 }
 0x10f   : > { %3497 = shalt.err (!%p3494_p1)
}
 0x110   : > { %3068 = dma.hbm_to_vmem [thread:$0]  (!%p3899_p9), %s4551_s7, 16, %s4095_s21, [#allocation14]  }
 0x111   : > { %s3753_s30 = smov [#allocation18]   ;;  %s3754_s17 = smov [#allocation21]  }
 0x112   : > { %s492_s0 = sshll.u32 %s3753_s30, 4  ;;  %s514_s28 = sshll.u32 %s3754_s17, 4  ;;  %s493_s0 = int_to_ptr.vmem [resolvable:$true] %s492_s0  ;;  %s4139_s28 = int_to_ptr.vmem [resolvable:$true] %s514_s28 }
 0x113   : > { %s3498_s16 = scalar_lea.hbm %s4553_s9, 16 }
 0x114   : > { %p3499_p4 = scmp.ne.s32.totalorder %s4553_s9, %s3498_s16  ;;  %p3505_p3 = scmp.lt.u32.totalorder %s3498_s16, %s4553_s9 }
 0x116   : > { %p3501_p6 = pnand %p3499_p4, %p3915_p11 }
 0x118   : > { %p3502_p2 = pneg %p3501_p6 }
 0x11a   : > { %p3507_p5 = pnand %p3505_p3, %p3502_p2 }
 0x11c   : > { %3510 = shalt.err (!%p3507_p5)
}
 0x11d   : > { %s3511_s27 = scalar_lea.vmem %s493_s0, 16  ;;  %s3518_s2 = scalar_lea.vmem %s493_s0, 32 }
 0x11e   : > { %p3512_p8 = scmp.ne.s32.totalorder %s493_s0, %s3511_s27  ;;  %p3519_p7 = scmp.lt.s32.totalorder %s493_s0, %s493_s0 }
 0x11f   : > { %p3520_p13 = scmp.lt.s32.totalorder %s3518_s2, %s3511_s27 }
 0x120   : > { %p3514_p10 = pnand %p3512_p8, %p3915_p11 }
 0x121   : > { %p3521_p0 = por %p3520_p13, %p3519_p7 }
 0x122   : > { %p3515_p12 = pneg %p3514_p10 }
 0x124   : > { %p3522_p1 = pnand %p3521_p0, %p3515_p12 }
 0x126   : > { %3525 = shalt.err (!%p3522_p1)
}
 0x127   : > { %3074 = dma.hbm_to_vmem [thread:$0]  (!%p3899_p9), %s4553_s9, 16, %s493_s0, [#allocation17]  }
 0x128   : > { %s3526_s1 = scalar_lea.hbm %s4555_s11, 16 }
 0x129   : > { %p3527_p4 = scmp.ne.s32.totalorder %s4555_s11, %s3526_s1  ;;  %p3533_p3 = scmp.lt.u32.totalorder %s3526_s1, %s4555_s11 }
 0x12b   : > { %p3529_p6 = pnand %p3527_p4, %p3915_p11 }
 0x12d   : > { %p3530_p2 = pneg %p3529_p6 }
 0x12f   : > { %p3535_p5 = pnand %p3533_p3, %p3530_p2 }
 0x131   : > { %3538 = shalt.err (!%p3535_p5)
}
 0x132   : > { %s3539_s0 = scalar_lea.vmem %s4139_s28, 16  ;;  %s3546_s29 = scalar_lea.vmem %s4139_s28, 32 }
 0x133   : > { %p3540_p8 = scmp.ne.s32.totalorder %s4139_s28, %s3539_s0  ;;  %p3547_p7 = scmp.lt.s32.totalorder %s4139_s28, %s4139_s28 }
 0x134   : > { %p3548_p13 = scmp.lt.s32.totalorder %s3546_s29, %s3539_s0 }
 0x135   : > { %p3542_p10 = pnand %p3540_p8, %p3915_p11 }
 0x136   : > { %p3549_p0 = por %p3548_p13, %p3547_p7 }
 0x137   : > { %p3543_p12 = pneg %p3542_p10 }
 0x139   : > { %p3550_p1 = pnand %p3549_p0, %p3543_p12 }
 0x13b   : > { %3553 = shalt.err (!%p3550_p1)
}
 0x13c   : > { %3080 = dma.hbm_to_vmem [thread:$0]  (!%p3899_p9), %s4555_s11, 16, %s4139_s28, [#allocation20]  }
 0x13d   : > { %s3755_s2 = smov [#allocation24]   ;;  %s3756_s22 = smov [#allocation27]  }
 0x13e   : > { %s538_s26 = sshll.u32 %s3755_s2, 4  ;;  %s562_s30 = sshll.u32 %s3756_s22, 4  ;;  %s539_s26 = int_to_ptr.vmem [resolvable:$true] %s538_s26  ;;  %s4183_s30 = int_to_ptr.vmem [resolvable:$true] %s562_s30 }
 0x13f   : > { %s3554_s19 = scalar_lea.hbm %s4557_s13, 32 }
 0x140   : > { %p3555_p4 = scmp.ne.s32.totalorder %s4557_s13, %s3554_s19  ;;  %p3561_p3 = scmp.lt.u32.totalorder %s3554_s19, %s4557_s13 }
 0x142   : > { %p3557_p6 = pnand %p3555_p4, %p3915_p11 }
 0x144   : > { %p3558_p2 = pneg %p3557_p6 }
 0x146   : > { %p3563_p5 = pnand %p3561_p3, %p3558_p2 }
 0x148   : > { %3566 = shalt.err (!%p3563_p5)
}
 0x149   : > { %s3567_s0 = scalar_lea.vmem %s539_s26, 32  ;;  %p3575_p7 = scmp.lt.s32.totalorder %s539_s26, %s539_s26 }
 0x14a   : > { %p3568_p8 = scmp.ne.s32.totalorder %s539_s26, %s3567_s0  ;;  %p3576_p13 = scmp.lt.s32.totalorder %s3567_s0, %s3567_s0 }
 0x14c   : > { %p3570_p10 = pnand %p3568_p8, %p3915_p11  ;;  %p3577_p0 = por %p3576_p13, %p3575_p7 }
 0x14e   : > { %p3571_p12 = pneg %p3570_p10 }
 0x150   : > { %p3578_p1 = pnand %p3577_p0, %p3571_p12 }
 0x152   : > { %3581 = shalt.err (!%p3578_p1)
}
 0x153   : > { %3086 = dma.hbm_to_vmem [thread:$0]  (!%p3899_p9), %s4557_s13, 32, %s539_s26, [#allocation23]  }
 0x154   : > { %s3582_s22 = scalar_lea.hbm %s4559_s15, 16 }
 0x155   : > { %p3583_p4 = scmp.ne.s32.totalorder %s4559_s15, %s3582_s22  ;;  %p3589_p3 = scmp.lt.u32.totalorder %s3582_s22, %s4559_s15 }
 0x157   : > { %p3585_p6 = pnand %p3583_p4, %p3915_p11 }
 0x159   : > { %p3586_p2 = pneg %p3585_p6 }
 0x15b   : > { %p3591_p5 = pnand %p3589_p3, %p3586_p2 }
 0x15d   : > { %3594 = shalt.err (!%p3591_p5)
}
 0x15e   : > { %s3595_s26 = scalar_lea.vmem %s4183_s30, 16  ;;  %s3602_s24 = scalar_lea.vmem %s4183_s30, 32 }
 0x15f   : > { %p3596_p8 = scmp.ne.s32.totalorder %s4183_s30, %s3595_s26  ;;  %p3603_p7 = scmp.lt.s32.totalorder %s4183_s30, %s4183_s30 }
 0x160   : > { %p3604_p13 = scmp.lt.s32.totalorder %s3602_s24, %s3595_s26 }
 0x161   : > { %p3598_p10 = pnand %p3596_p8, %p3915_p11 }
 0x162   : > { %p3605_p0 = por %p3604_p13, %p3603_p7 }
 0x163   : > { %p3599_p12 = pneg %p3598_p10 }
 0x165   : > { %p3606_p1 = pnand %p3605_p0, %p3599_p12 }
 0x167   : > { %3609 = shalt.err (!%p3606_p1)
}
 0x168   : > { %s4593_s0 = sld [smem:[#allocation41_spill]]  ;;  %s4594_s23 = sld [smem:[#allocation40_spill]] }
 0x169   : > { %s4595_s29 = sld [smem:[#allocation39_spill]]  ;;  %s4596_s21 = sld [smem:[#allocation42_spill]] }
 0x16a   : > { %3092 = dma.hbm_to_vmem [thread:$0]  (!%p3899_p9), %s4559_s15, 16, %s4183_s30, [#allocation26]  }
 0x16b   : > { %s2456_s25 = sadd.s32 4294967294, %s3736_s18   ;;  %s4229_s27 = sadd.s32 1, %s3736_s18  }
 0x16c   : > { %s47_s2 = ssub.s32 %s3736_s18, %s4229_s27  ;;  %p58_p6 = scmp.eq.s32.totalorder %s3736_s18, 0 }
 0x16d   : > { %p48_p11 = scmp.eq.s32.totalorder %s47_s2, 0  ;;  %p387_p10 = scmp.eq.s32.totalorder %s2456_s25, 1 }
 0x16e   : > { %s50_s22 = sadd.s32 1, %s4593_s0  ;;  %p57_p4 = scmp.ne.s32.totalorder %s4593_s0, %s4594_s23 }
 0x16f   : > { %p63_p2 = scmp.ne.s32.totalorder %s4594_s23, %s4595_s29  ;;  %p4598_p5 = scmp.eq.s32.totalorder %s4596_s21, 0 }
 0x170   : > { %s4240_s17 = scalar_select %p48_p11, %s4593_s0, %s50_s22  }
 0x171   : > { %p4242_p3 = por %p58_p6, %p57_p4  ;;  %p4248_p9 = por %p4598_p5, %p63_p2 }
 0x172   : > { %p381_p8 = scmp.eq.s32.totalorder %s4596_s21, 1  ;;  %p3115_p12 = scmp.lt.s32.totalorder %s3736_s18, 2 }
 0x173   : > { %s573_s19 = sand.u32 1, %s4593_s0   ;;  %p4259_p13 = por %p387_p10, %p63_p2 }
 0x174   : > { %p4255_p7 = por %p381_p8, %p57_p4  ;;  %s2473_s24 = sshll.u32 %s573_s19, 3 }
 0x175   : > { %s4601_s26 = scalar_select %p4259_p13, 1, 0 }
 0x176   : > { %s4600_s16 = scalar_select %p4255_p7, 1, 0 }
 0x177   : > { %s2474_s20 = sshll.u32 %s3736_s18, 7  ;;  %s4602_s29 = sld [smem:[#allocation45_spill]] }
 0x178   : > { %s577_s0 = scalar_lea.vmem [#allocation4], %s2473_s24  ;;  %p4273_p0 = pnand %p3115_p12, %p4242_p3 }
 0x179   : > { %s584_s21 = sshll.u32 %s577_s0, 4  ;;  %s574_s22 = scalar_lea.sflag [#allocation5], %s573_s19  ;;  %s4269_s21 = int_to_ptr.vmem [resolvable:$true] %s584_s21 }
 0x17a   : > { %p3612_p11 = pneg %p4273_p0 }
 0x17d   : > { %s4267_s2 = scalar_lea.hbm %s4602_s29, %s2474_s20  ;;  %s3615_s28 = scalar_lea.hbm %s4602_s29, 256 }
 0x17e   : > { %s3610_s3 = scalar_lea.hbm %s4267_s2, 128  ;;  %p3616_p2 = scmp.lt.u32.totalorder %s4267_s2, %s4602_s29 }
 0x17f   : > { %p3611_p1 = scmp.ne.s32.totalorder %s4267_s2, %s3610_s3  ;;  %p3617_p3 = scmp.lt.u32.totalorder %s3615_s28, %s3610_s3 }
 0x180   : > { %p3619_p8 = scmp.lt.u32.totalorder %s3610_s3, %s4267_s2 }
 0x181   : > { %p3613_p4 = pnand %p3612_p11, %p3611_p1  ;;  %p3618_p5 = por %p3617_p3, %p3616_p2 }
 0x183   : > { %p3614_p6 = pneg %p3613_p4  ;;  %p3620_p10 = por %p3619_p8, %p3618_p5 }
 0x185   : > { %p3621_p12 = pnand %p3620_p10, %p3614_p6 }
 0x187   : > { %3624 = shalt.err (!%p3621_p12)
}
 0x188   : > { %s3625_s19 = scalar_lea.vmem %s4269_s21, 128  ;;  %s3757_s0 = smov [#allocation4]  }
 0x189   : > { %p3626_p1 = scmp.ne.s32.totalorder %s4269_s21, %s3625_s19  ;;  %s3630_s24 = sshll.u32 %s3757_s0, 4  ;;  %s3631_s24 = int_to_ptr.vmem [resolvable:$false] %s3630_s24 }
 0x18a   : > { %s3632_s20 = scalar_lea.vmem %s3631_s24, 256  ;;  %p3633_p7 = scmp.lt.s32.totalorder %s4269_s21, %s3631_s24 }
 0x18b   : > { %p3628_p4 = pnand %p3626_p1, %p3612_p11  ;;  %p3634_p2 = scmp.lt.s32.totalorder %s3632_s20, %s3625_s19 }
 0x18d   : > { %p3629_p13 = pneg %p3628_p4  ;;  %p3635_p3 = por %p3634_p2, %p3633_p7 }
 0x18f   : > { %p3636_p5 = pnand %p3635_p3, %p3629_p13 }
 0x191   : > { %3639 = shalt.err (!%p3636_p5)
}
 0x192   : > { %3096 = dma.hbm_to_vmem [thread:$0]  (!%p4273_p0), %s4267_s2, 128, %s4269_s21, %s574_s22  }
 0x193   : > { %s4604_s3 = sld [smem:[#allocation43_spill]] }
 0x199   : > { %p4605_p6 = scmp.ne.s32.totalorder %s4604_s3, 0 }
 0x19a   : > { %s4606_s28 = sld [smem:[#allocation40_spill]] (!%p4605_p6) }
 0x19b   : > { %593 = sbr.rel (%p4605_p6) target bundleno = 4122 (0x101a), region = 80 }
 0x1a0   : > { %s4305_s1 = sand.u32 (!%p4605_p6), 1, %s4606_s28  }
 0x1a1   : > { %s2476_s23 = sshll.u32 (!%p4605_p6), %s4305_s1, 3  ;;  %s596_s19 = scalar_lea.sflag (!%p4605_p6), [#allocation5], %s4305_s1 }
 0x1a2   : > { %s4311_s0 = scalar_lea.vmem [#allocation4], %s2476_s23 }
 0x1a3   : > { %3687 = dma.done.wait (%p4248_p9), %s596_s19, 128  }
 0x1a4   : > { %3689 = vsyncadd (%p4248_p9), %s596_s19, 4294967168  ;;  %s4607_s2 = sld [smem:[#allocation42_spill]] }
 0x1aa   : > { %p4608_p7 = scmp.eq.s32.totalorder %s4607_s2, 0 }
 0x1ac   : > { %3691 = dma.done.wait (%p4608_p7), [#allocation8], 2064   ;;  %p4609_p13 = pmov %p4608_p7 }
 0x1ad   : > { %p4610_p0 = pmov %p4608_p7 }
 0x1ae   : > { %3693 = vsyncadd (%p4609_p13), [#allocation8], 4294965232 }
 0x1af   : > { %3695 = dma.done.wait (%p4610_p0), [#allocation11], 2064   ;;  %p4611_p11 = pmov %p4610_p0 }
 0x1b0   : > { %p4612_p8 = pmov %p4610_p0 }
 0x1b1   : > { %3697 = vsyncadd (%p4611_p11), [#allocation11], 4294965232 }
 0x1b2   : > { %3699 = dma.done.wait (%p4612_p8), [#allocation14], 2064   ;;  %p4613_p10 = pmov %p4610_p0 }
 0x1b3   : > { %p4614_p9 = pmov %p4610_p0 }
 0x1b4   : > { %3701 = vsyncadd (%p4613_p10), [#allocation14], 4294965232 }
 0x1b5   : > { %3703 = dma.done.wait (%p4614_p9), [#allocation17], 2064   ;;  %p4615_p12 = pmov %p4610_p0 }
 0x1b6   : > { %p4616_p1 = pmov %p4610_p0 }
 0x1b7   : > { %3705 = vsyncadd (%p4615_p12), [#allocation17], 4294965232 }
 0x1b8   : > { %3707 = dma.done.wait (%p4616_p1), [#allocation20], 32   ;;  %p4617_p4 = pmov %p4610_p0 }
 0x1b9   : > { %p4618_p2 = pmov %p4610_p0 }
 0x1ba   : > { %3709 = vsyncadd (%p4617_p4), [#allocation20], 4294967264 }
 0x1bb   : > { %3711 = dma.done.wait (%p4618_p2), [#allocation23], 4128   ;;  %p4619_p3 = pmov %p4610_p0 }
 0x1bc   : > { %p4620_p5 = pmov %p4610_p0 }
 0x1bd   : > { %3713 = vsyncadd (%p4619_p3), [#allocation23], 4294963168 }
 0x1be   : > { %3715 = dma.done.wait (%p4620_p5), [#allocation26], 4112   ;;  %p4621_p6 = pmov %p4610_p0 }
 0x1bf   : > { %v3758_v0 = vmov 0.0|0.0   ;;  %vm3759_vm0 = vmmov 0   ;;  %v3760_v1 = vmov 0.0   ;;  %v703_v2 = vld [vmem:[#allocation7] sm:$0xff]  ;;  %v704_v3 = vld [vmem:[#allocation7 + $0x8] sm:$0xff]  ;;  %v705_v7 = vld [vmem:[#allocation7 + $0x10] sm:$0xff] }
 0x1c0   : > { %3717 = vsyncadd (%p4621_p6), [#allocation26], 4294963184  ;;  %2830 = vmatprep.subr.bf16.mxu0 %v3758_v0  ;;  %2854 = vmatprep.subr.bf16.mxu1 %v3758_v0  ;;  %v797_v4 = vld [vmem:[#allocation10] sm:$0xff]  ;;  %v2831_v5 = vpack.c.bf16 %v704_v3, %v703_v2  ;;  %v798_v6 = vld [vmem:[#allocation10 + $0x8] sm:$0xff]  ;;  %vm989_vm1 = vcmask 261120   ;;  %s3761_s30 = smov 96  }
 0x1c1   : > { %2708 = vmatprep.mubr.msk.f32.mxu1 %vm3759_vm0, %v3760_v1  ;;  %2673 = vmatprep.mubr.msk.f32.mxu0 %vm3759_vm0, %v3760_v1  ;;  %v706_v8 = vld [vmem:[#allocation7 + $0x18] sm:$0xff]  ;;  %v2855_v9 = vpack.c.bf16 %v798_v6, %v797_v4  ;;  %v707_v14 = vld [vmem:[#allocation7 + $0x20] sm:$0xff]  ;;  %v708_v15 = vld [vmem:[#allocation7 + $0x28] sm:$0xff]  ;;  %s3762_s21 = smov 64   ;;  %s985_s25 = sld [smem:[#allocation3 + %s4607_s2]]  ;;  %vm1067_vm3 = vcmask 64512  }
 0x1c2   : > { %v799_v10 = vld [vmem:[#allocation10 + $0x10] sm:$0xff]  ;;  %v800_v11 = vld [vmem:[#allocation10 + $0x18] sm:$0xff]  ;;  %2832 = vmatpush3.bf16.msra.mxu0 %v2831_v5  ;;  %v2834_v12 = vpack.c.bf16 %v706_v8, %v705_v7  ;;  %v801_v16 = vld [vmem:[#allocation10 + $0x20] sm:$0xff]  ;;  %v2837_v18 = vpack.c.bf16 %v708_v15, %v707_v14  ;;  %s3763_s22 = smov 32   ;;  %s2516_s24 = sshll.u32 %s4607_s2, 7 }
 0x1c3   : > { %2856 = vmatpush3.bf16.msra.mxu1 %v2855_v9  ;;  %2833 = vmatprep.subr.bf16.mxu0 %v3758_v0  ;;  %v2858_v13 = vpack.c.bf16 %v800_v11, %v799_v10  ;;  %v802_v17 = vld [vmem:[#allocation10 + $0x28] sm:$0xff]  ;;  %v710_v21 = vld [vmem:[#allocation7 + $0x38] sm:$0xff]  ;;  %v711_v26 = vld [vmem:[#allocation7 + $0x40] sm:$0xff]  ;;  %s701_s20 = scalar_lea.vmem [#allocation28], %s2476_s23  ;;  %p4626_p13 = scmp.ne.s32.totalorder %s4600_s16, 0 }
 0x1c4   : > { %2857 = vmatprep.subr.bf16.mxu1 %v3758_v0  ;;  %v2861_v19 = vpack.c.bf16 %v802_v17, %v801_v16  ;;  %v709_v20 = vld [vmem:[#allocation7 + $0x30] sm:$0xff]  ;;  %v804_v23 = vld [vmem:[#allocation10 + $0x38] sm:$0xff]  ;;  %v712_v27 = vld [vmem:[#allocation7 + $0x48] sm:$0xff]  ;;  %s2253_s3 = sshll.u32 %s701_s20, 4  ;;  %s3764_s23 = smov [#allocation28]   ;;  %s4502_s3 = int_to_ptr.vmem [resolvable:$true] %s2253_s3 }
 0x1c5   : > { %v803_v22 = vld [vmem:[#allocation10 + $0x30] sm:$0xff]  ;;  %v2840_v24 = vpack.c.bf16 %v710_v21, %v709_v20  ;;  %v805_v28 = vld [vmem:[#allocation10 + $0x40] sm:$0xff]  ;;  %v806_v29 = vld [vmem:[#allocation10 + $0x48] sm:$0xff]  ;;  %v2843_v30 = vpack.c.bf16 %v712_v27, %v711_v26  ;;  %v983_v26 = vlaneseq  ;;  %s3644_s2 = sshll.u32 %s3764_s23, 4  ;;  %s3645_s2 = int_to_ptr.vmem [resolvable:$false] %s3644_s2 }
 0x1c6   : > { %2835 = vmatpush3.bf16.msra.mxu0 %v2834_v12  ;;  %v2864_v25 = vpack.c.bf16 %v804_v23, %v803_v22  ;;  %v2867_v31 = vpack.c.bf16 %v806_v29, %v805_v28  ;;  %v713_v32 = vld [vmem:[#allocation7 + $0x50] sm:$0xff]  ;;  %v714_v33 = vld [vmem:[#allocation7 + $0x58] sm:$0xff]  ;;  %v715_v38 = vld [vmem:[#allocation7 + $0x60] sm:$0xff]  ;;  %s3646_s4 = scalar_lea.vmem %s3645_s2, 256  ;;  %p3647_p8 = scmp.lt.s32.totalorder %s4502_s3, %s3645_s2 }
 0x1c7   : > { %2859 = vmatpush3.bf16.msra.mxu1 %v2858_v13  ;;  %2836 = vmatprep.subr.bf16.mxu0 %v3758_v0  ;;  %v807_v34 = vld [vmem:[#allocation10 + $0x50] sm:$0xff]  ;;  %v808_v35 = vld [vmem:[#allocation10 + $0x58] sm:$0xff]  ;;  %v2846_v36 = vpack.c.bf16 %v714_v33, %v713_v32  ;;  %v716_v39 = vld [vmem:[#allocation7 + $0x68] sm:$0xff]  ;;  %v984_v27 = vand.u32 127, %v983_v26  ;;  %v986_v28 = vstv %s985_s25  ;;  %s2240_s25 = scalar_lea.sflag [#allocation6], %s4305_s1 }
 0x1c8   : > { %2860 = vmatprep.subr.bf16.mxu1 %v3758_v0  ;;  %v2870_v37 = vpack.c.bf16 %v808_v35, %v807_v34  ;;  %v809_v40 = vld [vmem:[#allocation10 + $0x60] sm:$0xff]  ;;  %v810_v41 = vld [vmem:[#allocation10 + $0x68] sm:$0xff]  ;;  %v2849_v42 = vpack.c.bf16 %v716_v39, %v715_v38  ;;  %v718_v45 = vld [vmem:[#allocation7 + $0x78] sm:$0xff] }
 0x1c9   : > { %v2873_v43 = vpack.c.bf16 %v810_v41, %v809_v40  ;;  %v717_v44 = vld [vmem:[#allocation7 + $0x70] sm:$0xff]  ;;  %v812_v47 = vld [vmem:[#allocation10 + $0x78] sm:$0xff]  ;;  %v890_v50 = vld [vmem:[#allocation13] sm:$0xff]  ;;  %vm4409_vm2 = vcmp.lt.s32.totalorder %v984_v27, %v986_v28 }
 0x1ca   : > { %2838 = vmatpush3.bf16.msra.mxu0 %v2837_v18  ;;  %v811_v46 = vld [vmem:[#allocation10 + $0x70] sm:$0xff]  ;;  %v2852_v48 = vpack.c.bf16 %v718_v45, %v717_v44  ;;  %v893_v55 = vld [vmem:[#allocation13 + $0x18] sm:$0xff]  ;;  %v894_v57 = vld [vmem:[#allocation13 + $0x20] sm:$0xff] }
 0x1cb   : > { %2862 = vmatpush3.bf16.msra.mxu1 %v2861_v19  ;;  %2839 = vmatprep.subr.bf16.mxu0 %v3758_v0  ;;  %v2876_v49 = vpack.c.bf16 %v812_v47, %v811_v46  ;;  %v891_v51 = vld [vmem:[#allocation13 + $0x8] sm:$0xff]  ;;  %v892_v54 = vld [vmem:[#allocation13 + $0x10] sm:$0xff]  ;;  %v897_v61 = vld [vmem:[#allocation13 + $0x38] sm:$0xff] }
 0x1cc   : > { %2863 = vmatprep.subr.bf16.mxu1 %v3758_v0  ;;  %v4366_v52 = vld [vmem:[%s4311_s0] sm:$0xff]  ;;  %v2879_v53 = vpack.c.bf16 %v891_v51, %v890_v50  ;;  %v2882_v56 = vpack.c.bf16 %v893_v55, %v892_v54  ;;  %v898_v63 = vld [vmem:[#allocation13 + $0x40] sm:$0xff]  ;;  %v2492_v13 = vld [vmem:[#allocation9] ss:$0 sm:$0xff]  ;;  %s4624_s0 = sld [smem:[#allocation49_spill]] }
 0x1cd   : > { %v895_v58 = vld [vmem:[#allocation13 + $0x28] sm:$0xff]  ;;  %v896_v60 = vld [vmem:[#allocation13 + $0x30] sm:$0xff]  ;;  %v901_v5 = vld [vmem:[#allocation13 + $0x58] sm:$0xff] }
 0x1ce   : > { %2841 = vmatpush3.bf16.msra.mxu0 %v2840_v24  ;;  %v2885_v59 = vpack.c.bf16 %v895_v58, %v894_v57  ;;  %v2888_v62 = vpack.c.bf16 %v897_v61, %v896_v60  ;;  %v899_v2 = vld [vmem:[#allocation13 + $0x48] sm:$0xff]  ;;  %v900_v4 = vld [vmem:[#allocation13 + $0x50] sm:$0xff]  ;;  %v902_v7 = vld [vmem:[#allocation13 + $0x60] sm:$0xff] }
 0x1cf   : > { %2865 = vmatpush3.bf16.msra.mxu1 %v2864_v25  ;;  %2842 = vmatprep.subr.bf16.mxu0 %v3758_v0  ;;  %v2891_v3 = vpack.c.bf16 %v899_v2, %v898_v63  ;;  %v2894_v6 = vpack.c.bf16 %v901_v5, %v900_v4  ;;  %v903_v8 = vld [vmem:[#allocation13 + $0x68] sm:$0xff]  ;;  %v904_v10 = vld [vmem:[#allocation13 + $0x70] sm:$0xff]  ;;  %v905_v11 = vld [vmem:[#allocation13 + $0x78] sm:$0xff] }
 0x1d0   : > { %2866 = vmatprep.subr.bf16.mxu1 %v3758_v0  ;;  %v2897_v9 = vpack.c.bf16 %v903_v8, %v902_v7  ;;  %v2900_v12 = vpack.c.bf16 %v905_v11, %v904_v10  ;;  %v2493_v14 = vld [vmem:[#allocation12] ss:$0 sm:$0xff]  ;;  %v2494_v22 = vld [vmem:[#allocation15] ss:$0 sm:$0xff]  ;;  %v1152_v39 = vld [vmem:[#allocation16] sm:$0xff] }
 0x1d1   : > { %v1153_v40 = vld [vmem:[#allocation16 + $0x8] sm:$0xff]  ;;  %v1154_v41 = vld [vmem:[#allocation16 + $0x10] sm:$0xff]  ;;  %v1406_v7 = vld [vmem:[#allocation16 + $0x38] sm:$0xff] }
 0x1d2   : > { %2844 = vmatpush3.bf16.msra.mxu0 %v2843_v30  ;;  %v1404_v4 = vld [vmem:[#allocation16 + $0x28] sm:$0xff]  ;;  %v1405_v5 = vld [vmem:[#allocation16 + $0x30] sm:$0xff] }
 0x1d3   : > { %2868 = vmatpush3.bf16.msra.mxu1 %v2867_v31  ;;  %2845 = vmatprep.subr.bf16.mxu0 %v3758_v0  ;;  %v2912_v8 = vpack.c.bf16 %v1406_v7, %v1405_v5 }
 0x1d4   : > { %2869 = vmatprep.subr.bf16.mxu1 %v3758_v0 }
 0x1d6   : > { %2847 = vmatpush3.bf16.msra.mxu0 %v2846_v36 }
 0x1d7   : > { %2871 = vmatpush3.bf16.msra.mxu1 %v2870_v37  ;;  %2848 = vmatprep.subr.bf16.mxu0 %v3758_v0 }
 0x1d8   : > { %2872 = vmatprep.subr.bf16.mxu1 %v3758_v0 }
 0x1da   : > { %2850 = vmatpush3.bf16.msra.mxu0 %v2849_v42  ;;  %v2903_v42 = vpack.c.bf16 %v1153_v40, %v1152_v39  ;;  %v1649_v39 = vld [vmem:[#allocation16 + $0x50] sm:$0xff]  ;;  %v1650_v40 = vld [vmem:[#allocation16 + $0x58] sm:$0xff] }
 0x1db   : > { %2874 = vmatpush3.bf16.msra.mxu1 %v2873_v43  ;;  %2851 = vmatprep.subr.bf16.mxu0 %v3758_v0  ;;  %v1155_v43 = vld [vmem:[#allocation16 + $0x18] sm:$0xff] }
 0x1dc   : > { %2875 = vmatprep.subr.bf16.mxu1 %v3758_v0  ;;  %v2906_v44 = vpack.c.bf16 %v1155_v43, %v1154_v41  ;;  %v2918_v41 = vpack.c.bf16 %v1650_v40, %v1649_v39  ;;  %v2015_v39 = vld [vmem:[#allocation22 + $0x88] sm:$0xff]  ;;  %v2017_v40 = vld [vmem:[#allocation22 + $0x98] sm:$0xff] }
 0x1de   : > { %2853 = vmatpush3.bf16.msra.mxu0 %v2852_v48 }
 0x1df   : > { %2877 = vmatpush3.bf16.msra.mxu1 %v2876_v49  ;;  %2878 = vmatprep.subr.bf16.mxu0 %v3758_v0 }
 0x1e0   : > { %2746 = vmatprep.subr.mxu1 %v3760_v1 }
 0x1e1   : > { %2674 = vmatmul.mubr.f32.vlgmr.msra.gmra.mrb[0].mxu0 %v4366_v52 }
 0x1e2   : > { %2709 = vmatmul.mubr.f32.vlgmr.msra.gmra.mrb[0].mxu1 %v4366_v52  ;;  %2880 = vmatpush3.bf16.msra.mxu0 %v2879_v53 }
 0x1e3   : > { %2881 = vmatprep.subr.bf16.mxu0 %v3758_v0  ;;  %2743 = vmatprep.mubr.msk.f32.mxu0 %vm3759_vm0, %v3760_v1 }
 0x1e4   : > { %2748 = vmatprep.mubr.msk.f32.mxu1 %vm3759_vm0, %v3760_v1 }
 0x1e6   : > { %2883 = vmatpush3.bf16.msra.mxu0 %v2882_v56 }
 0x1e7   : > { %2884 = vmatprep.subr.bf16.mxu0 %v3758_v0 }
 0x1ea   : > { %2886 = vmatpush3.bf16.msra.mxu0 %v2885_v59 }
 0x1eb   : > { %2887 = vmatprep.subr.bf16.mxu0 %v3758_v0 }
 0x1ee   : > { %2889 = vmatpush3.bf16.msra.mxu0 %v2888_v62 }
 0x1ef   : > { %2890 = vmatprep.subr.bf16.mxu0 %v3758_v0 }
 0x1f2   : > { %2892 = vmatpush3.bf16.msra.mxu0 %v2891_v3  ;;  %v1403_v3 = vld [vmem:[#allocation16 + $0x20] sm:$0xff] }
 0x1f3   : > { %2893 = vmatprep.subr.bf16.mxu0 %v3758_v0 }
 0x1f6   : > { %2895 = vmatpush3.bf16.msra.mxu0 %v2894_v6  ;;  %v2909_v6 = vpack.c.bf16 %v1404_v4, %v1403_v3 }
 0x1f7   : > { %2896 = vmatprep.subr.bf16.mxu0 %v3758_v0 }
 0x1fa   : > { %2898 = vmatpush3.bf16.msra.mxu0 %v2897_v9 }
 0x1fb   : > { %2899 = vmatprep.subr.bf16.mxu0 %v3758_v0 }
 0x1fe   : > { %2901 = vmatpush3.bf16.msra.mxu0 %v2900_v12 }
 0x1ff   : > { %2914 = vmatprep.subr.bf16.mxu0 %v3758_v0 }
 0x201   : > { %2744 = vmatmul.mubr.f32.vlgmr.msra.gmra.mrb[2].mxu0 %v4366_v52 }
 0x202   : > { %2806 = vmatprep.mubr.msk.f32.mxu0 %vm3759_vm0, %v3760_v1 }
 0x2b4   : > { %v792_v15 = vpop.f32.mrb[0].mxu0 }
 0x2b5   : > { %v886_v16 = vpop.f32.mrb[0].mxu1  ;;  %v793_v17 = vadd.f32 %v2492_v13, %v792_v15  ;;  %v2675_v18 = vpop.f32.mrb[1].mxu0 }
 0x2b6   : > { %v4387_v19 = vadd.f32 %v2493_v14, %v886_v16  ;;  %v2710_v20 = vpop.f32.mrb[1].mxu1 }
 0x2b7   : > { %v4389_v21 = vmul.f32 0.17677669, %v793_v17  ;;  %v2499_v17 = vld [vmem:[#allocation18] ss:$0 sm:$0xff] }
 0x2b8   : > { %1238 = vrot.lane.b32.xlu1 %v4387_v19, %s3761_s30  ;;  %2747 = vmatpush3.xpose.msk.msra.mxu1 %vm989_vm1, %v4387_v19 }
 0x2b9   : > { %2751 = vmatprep.subr.mxu1 %v3760_v1 }
 0x2bb   : > { %2749 = vmatmul.mubr.msk.f32.vlgmr.msra.gmra.mrb[2].mxu1 %vm989_vm1, %v4389_v21 }
 0x2bc   : > { %1236 = vrot.lane.b32.xlu1 %v4389_v21, %s3761_s30  ;;  %2753 = vmatprep.mubr.msk.f32.mxu1 %vm3759_vm0, %v3760_v1 }
 0x2d4   : > { %v979_v23 = vpop.f32.mrb[2].mxu0 }
 0x2d5   : > { %v4400_v24 = vadd.f32 %v2494_v22, %v979_v23  ;;  %v2745_v25 = vpop.f32.mrb[3].mxu0 }
 0x2d7   : > { %1325 = vrot.lane.b32.xlu1 %v4400_v24, %s3761_s30  ;;  %2752 = vmatpush3.msra.mxu1 %v4400_v24  ;;  %s4625_s30 = smov %s4624_s0 }
 0x2d8   : > { %2902 = vmatprep.subr.bf16.mxu1 %v3758_v0 }
 0x2db   : > { %1483 = vrot.lane.b32.xlu1 %v4387_v19, %s3762_s21 }
 0x32a   : > { %v1239_v46 = vpop.permute.xlu1 %1238 }
 0x32e   : > { %v1237_v51 = vpop.permute.xlu1 %1236 }
 0x349   : > { %v1326_v53 = vpop.permute.xlu1 %1325 }
 0x34d   : > { %v1484_v15 = vpop.permute.xlu1 %1483 }
 0x38e   : > { %v1062_v30 = vpop.f32.mrb[2].mxu1 }
 0x38f   : > { %v1066_v31 = vsel %vm4409_vm2, %v1062_v30, -1e+10  ;;  %v2750_v32 = vpop.f32.mrb[3].mxu1 }
 0x390   : > { %v1068_v33 = vsel %vm1067_vm3, %v1066_v31, -inf }
 0x391   : > { %1069 = vmax.xlane.f32.xlu0 %v1068_v33 }
 0x41e   : > { %v1070_v34 = vpop.xlane.xlu0 %1069 }
 0x41f   : > { %v1071_v35 = vsub.f32 %v1066_v31, %v1070_v34 }
 0x421   : > { %v1072_v36 = vmul.f32 1.442695, %v1071_v35 }
 0x423   : > { %3188 = vpow2.f32 %v1072_v36  ;;  %v1647_v36 = vld [vmem:[#allocation16 + $0x40] sm:$0xff] }
 0x42d   : > { %v3189_v37 = vpop.eup %3188 }
 0x42e   : > { %2754 = vmatmul.mubr.msk.f32.vlgmr.msra.gmra.mrb[4].mxu1 %vm1067_vm3, %v3189_v37  ;;  %v1074_v38 = vsel %vm1067_vm3, %v3189_v37, 0.0  ;;  %v1648_v37 = vld [vmem:[#allocation16 + $0x48] sm:$0xff] }
 0x42f   : > { %1075 = vadd.xlane.f32.xlu0 %v1074_v38  ;;  %2764 = vmatprep.mubr.msk.f32.mxu1 %vm3759_vm0, %v3760_v1  ;;  %v2915_v38 = vpack.c.bf16 %v1648_v37, %v1647_v36  ;;  %v2010_v36 = vld [vmem:[#allocation22 + $0x60] sm:$0xff]  ;;  %v2012_v37 = vld [vmem:[#allocation22 + $0x70] sm:$0xff] }
 0x430   : > { %2904 = vmatpush3.bf16.msra.mxu1 %v2903_v42 }
 0x431   : > { %2905 = vmatprep.subr.bf16.mxu1 %v3758_v0  ;;  %2916 = vmatpush3.bf16.msra.mxu0 %v2915_v38  ;;  %v2940_v38 = vpack.c.bf16 %v2012_v37, %v2010_v36  ;;  %v2143_v36 = vld [vmem:[#allocation25 + $0xe0] sm:$0xff]  ;;  %v2144_v37 = vld [vmem:[#allocation25 + $0xe8] sm:$0xff] }
 0x432   : > { %2917 = vmatprep.subr.bf16.mxu0 %v3758_v0 }
 0x434   : > { %2907 = vmatpush3.bf16.msra.mxu1 %v2906_v44 }
 0x435   : > { %2767 = vmatprep.subr.mxu1 %v3760_v1  ;;  %2919 = vmatpush3.bf16.msra.mxu0 %v2918_v41  ;;  %v2942_v41 = vpack.c.bf16 %v2017_v40, %v2015_v39  ;;  %v2982_v39 = vpack.c.bf16 %v2144_v37, %v2143_v36 }
 0x436   : > { %2920 = vmatprep.subr.bf16.mxu0 %v3758_v0 }
 0x4bc   : > { %v1076_v45 = vpop.xlane.xlu0 %1075 }
 0x4bd   : > { %3190 = vrcp.f32 %v1076_v45 }
 0x4c7   : > { %v3191_v47 = vpop.eup %3190 }
 0x501   : > { %v1146_v48 = vpop.f32.mrb[4].mxu1 }
 0x502   : > { %v1151_v49 = vmul.f32 %v3191_v47, %v1146_v48  ;;  %v2755_v50 = vpop.f32.mrb[5].mxu1 }
 0x504   : > { %2765 = vmatmul.mubr.msk.f32.vlgmr.msra.gmra.mrb[6].mxu1 %vm989_vm1, %v1151_v49 }
 0x505   : > { %2768 = vmatpush3.xpose.msk.msra.mxu1 %vm989_vm1, %v1239_v46  ;;  %2769 = vmatprep.mubr.msk.f32.mxu1 %vm3759_vm0, %v3760_v1 }
 0x506   : > { %2772 = vmatprep.subr.mxu1 %v3760_v1 }
 0x508   : > { %2770 = vmatmul.mubr.msk.f32.vlgmr.msra.gmra.mrb[8].mxu1 %vm989_vm1, %v1237_v51 }
 0x509   : > { %2773 = vmatpush3.msra.mxu1 %v1326_v53  ;;  %2774 = vmatprep.mubr.msk.f32.mxu1 %vm3759_vm0, %v3760_v1 }
 0x50a   : > { %2908 = vmatprep.subr.bf16.mxu1 %v3758_v0 }
 0x5d7   : > { %v1225_v54 = vpop.f32.mrb[6].mxu1 }
 0x5d8   : > { %v2766_v55 = vpop.f32.mrb[7].mxu1  ;;  %v1235_v18 = vadd.f32 %v2499_v17, %v1225_v54 }
 0x5db   : > { %v1310_v56 = vpop.f32.mrb[8].mxu1 }
 0x5dc   : > { %v1314_v57 = vsel %vm4409_vm2, %v1310_v56, -1e+10  ;;  %v2771_v58 = vpop.f32.mrb[9].mxu1 }
 0x5dd   : > { %v1315_v59 = vsel %vm1067_vm3, %v1314_v57, -inf  ;;  %v1892_v58 = vld [vmem:[#allocation16 + $0x68] sm:$0xff] }
 0x5de   : > { %1316 = vmax.xlane.f32.xlu0 %v1315_v59 }
 0x66b   : > { %v1317_v60 = vpop.xlane.xlu0 %1316 }
 0x66c   : > { %v1318_v61 = vsub.f32 %v1314_v57, %v1317_v60  ;;  %v1891_v57 = vld [vmem:[#allocation16 + $0x60] sm:$0xff] }
 0x66d   : > { %v2921_v29 = vpack.c.bf16 %v1892_v58, %v1891_v57  ;;  %v2027_v57 = vld [vmem:[#allocation22 + $0xe8] sm:$0xff]  ;;  %v2029_v58 = vld [vmem:[#allocation22 + $0xf8] sm:$0xff] }
 0x66e   : > { %v1319_v62 = vmul.f32 1.442695, %v1318_v61 }
 0x670   : > { %3192 = vpow2.f32 %v1319_v62  ;;  %v1893_v62 = vld [vmem:[#allocation16 + $0x70] sm:$0xff] }
 0x67a   : > { %v3193_v63 = vpop.eup %3192 }
 0x67b   : > { %2775 = vmatmul.mubr.msk.f32.vlgmr.msra.gmra.mrb[10].mxu1 %vm1067_vm3, %v3193_v63  ;;  %v1321_v2 = vsel %vm1067_vm3, %v3193_v63, 0.0  ;;  %v1894_v63 = vld [vmem:[#allocation16 + $0x78] sm:$0xff] }
 0x67c   : > { %1322 = vadd.xlane.f32.xlu0 %v1321_v2  ;;  %2785 = vmatprep.mubr.msk.f32.mxu1 %vm3759_vm0, %v3760_v1  ;;  %v2924_v2 = vpack.c.bf16 %v1894_v63, %v1893_v62  ;;  %v2131_v63 = vld [vmem:[#allocation25 + $0x80] sm:$0xff] }
 0x67d   : > { %2910 = vmatpush3.bf16.msra.mxu1 %v2909_v6 }
 0x67e   : > { %2911 = vmatprep.subr.bf16.mxu1 %v3758_v0 }
 0x681   : > { %2913 = vmatpush3.bf16.msra.mxu1 %v2912_v8 }
 0x682   : > { %2788 = vmatprep.subr.mxu1 %v3760_v1 }
 0x692   : > { %1481 = vrot.lane.b32.xlu0 %v4389_v21, %s3762_s21 }
 0x696   : > { %1569 = vrot.lane.b32.xlu0 %v4400_v24, %s3762_s21  ;;  %s4500_s21 = scalar_lea.hbm %s4624_s0, %s2516_s24 }
 0x69a   : > { %1727 = vrot.lane.b32.xlu0 %v4387_v19, %s3763_s22 }
 0x69e   : > { %1725 = vrot.lane.b32.xlu0 %v4389_v21, %s3763_s22 }
 0x709   : > { %v1323_v9 = vpop.xlane.xlu0 %1322 }
 0x70a   : > { %3194 = vrcp.f32 %v1323_v9 }
 0x70d   : > { %v1482_v12 = vpop.permute.xlu0 %1481 }
 0x711   : > { %v1570_v16 = vpop.permute.xlu0 %1569 }
 0x714   : > { %v3195_v10 = vpop.eup %3194 }
 0x715   : > { %v1728_v32 = vpop.permute.xlu0 %1727 }
 0x719   : > { %v1726_v35 = vpop.permute.xlu0 %1725 }
 0x74e   : > { %v1397_v11 = vpop.f32.mrb[10].mxu1 }
 0x74f   : > { %v1402_v13 = vmul.f32 %v3195_v10, %v1397_v11  ;;  %v2776_v14 = vpop.f32.mrb[11].mxu1  ;;  %v1999_v10 = vld [vmem:[#allocation22 + $0x8] sm:$0xff]  ;;  %v2001_v11 = vld [vmem:[#allocation22 + $0x18] sm:$0xff] }
 0x750   : > { %v2000_v14 = vld [vmem:[#allocation22 + $0x10] sm:$0xff] }
 0x751   : > { %2786 = vmatmul.mubr.msk.f32.vlgmr.msra.gmra.mrb[12].mxu1 %vm989_vm1, %v1402_v13  ;;  %v2926_v13 = vpack.c.bf16 %v2001_v11, %v1999_v10  ;;  %v2135_v10 = vld [vmem:[#allocation25 + $0xa0] sm:$0xff]  ;;  %v2136_v11 = vld [vmem:[#allocation25 + $0xa8] sm:$0xff] }
 0x752   : > { %2789 = vmatpush3.xpose.msk.msra.mxu1 %vm989_vm1, %v1484_v15  ;;  %2790 = vmatprep.mubr.msk.f32.mxu1 %vm3759_vm0, %v3760_v1  ;;  %v2003_v15 = vld [vmem:[#allocation22 + $0x28] sm:$0xff] }
 0x753   : > { %2793 = vmatprep.subr.mxu1 %v3760_v1 }
 0x755   : > { %2791 = vmatmul.mubr.msk.f32.vlgmr.msra.gmra.mrb[14].mxu1 %vm989_vm1, %v1482_v12  ;;  %v1998_v12 = vld [vmem:[#allocation22] sm:$0xff] }
 0x756   : > { %2794 = vmatpush3.msra.mxu1 %v1570_v16  ;;  %2795 = vmatprep.mubr.msk.f32.mxu1 %vm3759_vm0, %v3760_v1  ;;  %v2005_v16 = vld [vmem:[#allocation22 + $0x38] sm:$0xff]  ;;  %v2928_v17 = vpack.c.bf16 %v2000_v14, %v1998_v12  ;;  %v2119_v14 = vld [vmem:[#allocation25 + $0x20] sm:$0xff] }
 0x757   : > { %2809 = vmatprep.subr.mxu1 %v3760_v1 }
 0x824   : > { %v1476_v19 = vpop.f32.mrb[12].mxu1 }
 0x825   : > { %v4457_v20 = vadd.f32 %v1476_v19, %v1235_v18  ;;  %v2787_v21 = vpop.f32.mrb[13].mxu1  ;;  %v2930_v18 = vpack.c.bf16 %v2005_v16, %v2003_v15  ;;  %v2002_v19 = vld [vmem:[#allocation22 + $0x20] sm:$0xff]  ;;  %v2120_v15 = vld [vmem:[#allocation25 + $0x28] sm:$0xff]  ;;  %v2137_v16 = vld [vmem:[#allocation25 + $0xb0] sm:$0xff] }
 0x826   : > { %v2007_v21 = vld [vmem:[#allocation22 + $0x48] sm:$0xff] }
 0x828   : > { %v1555_v22 = vpop.f32.mrb[14].mxu1 }
 0x829   : > { %v1559_v23 = vsel %vm4409_vm2, %v1555_v22, -1e+10  ;;  %v2792_v25 = vpop.f32.mrb[15].mxu1  ;;  %v2009_v22 = vld [vmem:[#allocation22 + $0x58] sm:$0xff] }
 0x82a   : > { %v1560_v27 = vsel %vm1067_vm3, %v1559_v23, -inf  ;;  %v2934_v25 = vpack.c.bf16 %v2009_v22, %v2007_v21  ;;  %v2122_v21 = vld [vmem:[#allocation25 + $0x38] sm:$0xff]  ;;  %v2139_v22 = vld [vmem:[#allocation25 + $0xc0] sm:$0xff] }
 0x82b   : > { %1561 = vmax.xlane.f32.xlu1 %v1560_v27  ;;  %v2008_v27 = vld [vmem:[#allocation22 + $0x50] sm:$0xff] }
 0x83c   : > { %1813 = vrot.lane.b32.xlu1 %v4400_v24, %s3763_s22  ;;  %s3640_s22 = scalar_lea.vmem %s4502_s3, 128 }
 0x83d   : > { %p3641_p7 = scmp.ne.s32.totalorder %s4502_s3, %s3640_s22  ;;  %p3648_p10 = scmp.lt.s32.totalorder %s3646_s4, %s3640_s22 }
 0x83f   : > { %p3642_p0 = pnand %p3641_p7, %p4626_p13  ;;  %p3649_p9 = por %p3648_p10, %p3647_p8 }
 0x841   : > { %p3643_p11 = pneg %p3642_p0 }
 0x843   : > { %p3650_p12 = pnand %p3649_p9, %p3643_p11 }
 0x8b8   : > { %v1562_v28 = vpop.xlane.xlu1 %1561 }
 0x8b9   : > { %v1563_v30 = vsub.f32 %v1559_v23, %v1562_v28  ;;  %v2011_v28 = vld [vmem:[#allocation22 + $0x68] sm:$0xff] }
 0x8bb   : > { %v1564_v31 = vmul.f32 1.442695, %v1563_v30  ;;  %v2013_v30 = vld [vmem:[#allocation22 + $0x78] sm:$0xff] }
 0x8bc   : > { %v1814_v24 = vpop.permute.xlu1 %1813 }
 0x8bd   : > { %3196 = vpow2.f32 %v1564_v31 }
 0x8c7   : > { %v3197_v33 = vpop.eup %3196 }
 0x8c8   : > { %2796 = vmatmul.mubr.msk.f32.vlgmr.msra.gmra.mrb[16].mxu1 %vm1067_vm3, %v3197_v33  ;;  %v1566_v34 = vsel %vm1067_vm3, %v3197_v33, 0.0 }
 0x8c9   : > { %2810 = vmatpush3.xpose.msk.msra.mxu1 %vm989_vm1, %v1728_v32  ;;  %1567 = vadd.xlane.f32.xlu1 %v1566_v34  ;;  %v2938_v32 = vpack.c.bf16 %v2013_v30, %v2011_v28  ;;  %v2124_v28 = vld [vmem:[#allocation25 + $0x48] sm:$0xff]  ;;  %v2141_v30 = vld [vmem:[#allocation25 + $0xd0] sm:$0xff] }
 0x8ca   : > { %2811 = vmatprep.mubr.msk.f32.mxu1 %vm3759_vm0, %v3760_v1  ;;  %2814 = vmatprep.subr.mxu1 %v3760_v1 }
 0x8cc   : > { %2812 = vmatmul.mubr.msk.f32.vlgmr.msra.gmra.mrb[18].mxu1 %vm989_vm1, %v1726_v35 }
 0x8cd   : > { %2815 = vmatpush3.msra.mxu1 %v1814_v24  ;;  %2816 = vmatprep.mubr.msk.f32.mxu1 %vm3759_vm0, %v3760_v1 }
 0x8ce   : > { %2927 = vmatprep.subr.bf16.mxu1 %v2926_v13  ;;  %v2966_v13 = vpack.c.bf16 %v2136_v11, %v2135_v10 }
 0x956   : > { %v1568_v42 = vpop.xlane.xlu1 %1567 }
 0x957   : > { %3198 = vrcp.f32 %v1568_v42  ;;  %v2014_v42 = vld [vmem:[#allocation22 + $0x80] sm:$0xff] }
 0x961   : > { %v3199_v43 = vpop.eup %3198 }
 0x99b   : > { %v1641_v44 = vpop.f32.mrb[16].mxu1 }
 0x99c   : > { %v1646_v45 = vmul.f32 %v3199_v43, %v1641_v44  ;;  %v2797_v46 = vpop.f32.mrb[17].mxu1  ;;  %v2016_v43 = vld [vmem:[#allocation22 + $0x90] sm:$0xff] }
 0x99d   : > { %v2944_v44 = vpack.c.bf16 %v2016_v43, %v2014_v42  ;;  %v2021_v46 = vld [vmem:[#allocation22 + $0xb8] sm:$0xff] }
 0x99e   : > { %2807 = vmatmul.mubr.msk.f32.vlgmr.msra.gmra.mrb[4].mxu0 %vm989_vm1, %v1646_v45  ;;  %v2019_v45 = vld [vmem:[#allocation22 + $0xa8] sm:$0xff]  ;;  %v2512_v43 = vld [vmem:[#allocation19] ss:$0 sm:$0xff] }
 0x99f   : > { %v1799_v47 = vpop.f32.mrb[18].mxu1  ;;  %2827 = vmatprep.mubr.msk.f32.mxu0 %vm3759_vm0, %v3760_v1  ;;  %2922 = vmatpush3.bf16.msra.mxu0 %v2921_v29 }
 0x9a0   : > { %v1803_v48 = vsel %vm4409_vm2, %v1799_v47, -1e+10  ;;  %v2813_v49 = vpop.f32.mrb[19].mxu1  ;;  %2923 = vmatprep.subr.bf16.mxu0 %v3758_v0  ;;  %v2018_v47 = vld [vmem:[#allocation22 + $0xa0] sm:$0xff] }
 0x9a1   : > { %v1804_v50 = vsel %vm1067_vm3, %v1803_v48, -inf  ;;  %v2020_v49 = vld [vmem:[#allocation22 + $0xb0] sm:$0xff] }
 0x9a2   : > { %1805 = vmax.xlane.f32.xlu0 %v1804_v50  ;;  %v2023_v50 = vld [vmem:[#allocation22 + $0xc8] sm:$0xff] }
 0x9a3   : > { %2925 = vmatpush3.bf16.msra.mxu0 %v2924_v2  ;;  %v2132_v2 = vld [vmem:[#allocation25 + $0x88] sm:$0xff] }
 0xa2f   : > { %v1806_v51 = vpop.xlane.xlu0 %1805 }
 0xa30   : > { %v1807_v53 = vsub.f32 %v1803_v48, %v1806_v51  ;;  %v2946_v48 = vpack.c.bf16 %v2021_v46, %v2019_v45  ;;  %v2025_v51 = vld [vmem:[#allocation22 + $0xd8] sm:$0xff] }
 0xa31   : > { %v2513_v46 = vld [vmem:[#allocation21] ss:$0 sm:$0xff] }
 0xa32   : > { %v1808_v54 = vmul.f32 1.442695, %v1807_v53  ;;  %v2948_v53 = vpack.c.bf16 %v2020_v49, %v2018_v47  ;;  %v2127_v49 = vld [vmem:[#allocation25 + $0x60] sm:$0xff] }
 0xa34   : > { %3200 = vpow2.f32 %v1808_v54  ;;  %v2950_v54 = vpack.c.bf16 %v2025_v51, %v2023_v50  ;;  %v2128_v50 = vld [vmem:[#allocation25 + $0x68] sm:$0xff] }
 0xa35   : > { %v2984_v51 = vpack.c.bf16 %v2128_v50, %v2127_v49 }
 0xa3e   : > { %v3201_v55 = vpop.eup %3200 }
 0xa3f   : > { %2817 = vmatmul.mubr.msk.f32.vlgmr.msra.gmra.mrb[20].mxu1 %vm1067_vm3, %v3201_v55  ;;  %v1810_v56 = vsel %vm1067_vm3, %v3201_v55, 0.0  ;;  %v2022_v55 = vld [vmem:[#allocation22 + $0xc0] sm:$0xff] }
 0xa40   : > { %1811 = vadd.xlane.f32.xlu0 %v1810_v56  ;;  %2106 = vmatprep.mubr.f32.mxu1 %v3760_v1  ;;  %v2024_v56 = vld [vmem:[#allocation22 + $0xd0] sm:$0xff] }
 0xa41   : > { %2929 = vmatpush1.bf16.msra.mxu1 %v2928_v17  ;;  %v2952_v29 = vpack.c.bf16 %v2024_v56, %v2022_v55  ;;  %v2138_v17 = vld [vmem:[#allocation25 + $0xb8] sm:$0xff]  ;;  %v2129_v56 = vld [vmem:[#allocation25 + $0x70] sm:$0xff] }
 0xa42   : > { %2931 = vmatprep.subr.bf16.mxu1 %v2930_v18  ;;  %v2968_v18 = vpack.c.bf16 %v2120_v15, %v2119_v14 }
 0xa71   : > { %v1720_v59 = vpop.f32.mrb[4].mxu0 }
 0xa72   : > { %v1724_v60 = vadd.f32 %v1720_v59, %v4457_v20  ;;  %v2808_v61 = vpop.f32.mrb[5].mxu0  ;;  %v2004_v20 = vld [vmem:[#allocation22 + $0x30] sm:$0xff]  ;;  %v2954_v59 = vpack.c.bf16 %v2029_v58, %v2027_v57  ;;  %v2130_v57 = vld [vmem:[#allocation25 + $0x78] sm:$0xff] }
 0xa73   : > { %v2932_v23 = vpack.c.bf16 %v2004_v20, %v2002_v19  ;;  %v2028_v61 = vld [vmem:[#allocation22 + $0xf0] sm:$0xff]  ;;  %v2970_v19 = vpack.c.bf16 %v2138_v17, %v2137_v16  ;;  %v2988_v58 = vpack.c.bf16 %v2130_v57, %v2129_v56 }
 0xa74   : > { %v2121_v20 = vld [vmem:[#allocation25 + $0x30] sm:$0xff] }
 0xa75   : > { %2933 = vmatpush1.bf16.msra.mxu1 %v2932_v23  ;;  %v2140_v23 = vld [vmem:[#allocation25 + $0xc8] sm:$0xff] }
 0xa76   : > { %2935 = vmatprep.subr.bf16.mxu1 %v2934_v25  ;;  %v2972_v25 = vpack.c.bf16 %v2122_v21, %v2121_v20 }
 0xacd   : > { %v1812_v3 = vpop.xlane.xlu0 %1811 }
 0xace   : > { %3202 = vrcp.f32 %v1812_v3  ;;  %v2115_v3 = vld [vmem:[#allocation25] sm:$0xff] }
 0xad8   : > { %v3203_v4 = vpop.eup %3202 }
 0xb12   : > { %v1885_v5 = vpop.f32.mrb[20].mxu1 }
 0xb13   : > { %v1890_v6 = vmul.f32 %v3203_v4, %v1885_v5  ;;  %v2818_v1 = vpop.f32.mrb[21].mxu1  ;;  %v2958_v4 = vpack.c.bf16 %v2132_v2, %v2131_v63  ;;  %v2116_v5 = vld [vmem:[#allocation25 + $0x8] sm:$0xff] }
 0xb14   : > { %v2134_v1 = vld [vmem:[#allocation25 + $0x98] sm:$0xff] }
 0xb15   : > { %2828 = vmatmul.mubr.msk.f32.vlgmr.msra.gmra.mrb[6].mxu0 %vm989_vm1, %v1890_v6  ;;  %v2133_v6 = vld [vmem:[#allocation25 + $0x90] sm:$0xff]  ;;  %2959 = vmatprep.subr.bf16.mxu0 %v2958_v4 }
 0xbe8   : > { %v1964_v7 = vpop.f32.mrb[6].mxu0 }
 0xbe9   : > { %v1968_v8 = vadd.f32 %v1964_v7, %v1724_v60  ;;  %v2829_v9 = vpop.f32.mrb[7].mxu0  ;;  %v2026_v60 = vld [vmem:[#allocation22 + $0xe0] sm:$0xff]  ;;  %v2960_v7 = vpack.c.bf16 %v2116_v5, %v2115_v3 }
 0xbea   : > { %v2956_v62 = vpack.c.bf16 %v2028_v61, %v2026_v60  ;;  %v2117_v9 = vld [vmem:[#allocation25 + $0x10] sm:$0xff] }
 0xbeb   : > { %v1971_v0 = vadd.f32 %v1968_v8, %v4366_v52  ;;  %v2006_v52 = vld [vmem:[#allocation22 + $0x40] sm:$0xff]  ;;  %v2962_v8 = vpack.c.bf16 %v2134_v1, %v2133_v6  ;;  %2961 = vmatpush3.bf16.msra.mxu0 %v2960_v7 }
 0xbec   : > { %v2936_v31 = vpack.c.bf16 %v2008_v27, %v2006_v52  ;;  %v2974_v52 = vpack.c.bf16 %v2140_v23, %v2139_v22  ;;  %v2123_v27 = vld [vmem:[#allocation25 + $0x40] sm:$0xff] }
 0xbed   : > { %1972 = vadd.xlane.f32.xlu0 %v1971_v0  ;;  %2963 = vmatprep.subr.bf16.mxu0 %v2962_v8  ;;  %v2514_v7 = vld [vmem:[#allocation27] ss:$0 sm:$0xff] }
 0xbee   : > { %2937 = vmatpush1.bf16.msra.mxu1 %v2936_v31  ;;  %v2142_v31 = vld [vmem:[#allocation25 + $0xd8] sm:$0xff] }
 0xbef   : > { %2939 = vmatprep.subr.bf16.mxu1 %v2938_v32  ;;  %v2976_v32 = vpack.c.bf16 %v2124_v28, %v2123_v27 }
 0xbf2   : > { %2941 = vmatpush1.bf16.msra.mxu1 %v2940_v38 }
 0xbf3   : > { %2943 = vmatprep.subr.bf16.mxu1 %v2942_v41 }
 0xbf6   : > { %2945 = vmatpush1.bf16.msra.mxu1 %v2944_v44 }
 0xbf7   : > { %2947 = vmatprep.subr.bf16.mxu1 %v2946_v48 }
 0xbfa   : > { %2949 = vmatpush1.bf16.msra.mxu1 %v2948_v53  ;;  %v2145_v53 = vld [vmem:[#allocation25 + $0xf0] sm:$0xff] }
 0xbfb   : > { %2951 = vmatprep.subr.bf16.mxu1 %v2950_v54  ;;  %v2146_v54 = vld [vmem:[#allocation25 + $0xf8] sm:$0xff] }
 0xbfc   : > { %v2986_v55 = vpack.c.bf16 %v2146_v54, %v2145_v53 }
 0xbfe   : > { %2953 = vmatpush1.bf16.msra.mxu1 %v2952_v29  ;;  %v2033_v29 = vshrl.u32 %v983_v26, 7 }
 0xbff   : > { %2955 = vmatprep.subr.bf16.mxu1 %v2954_v59  ;;  %v2030_v59 = vld [vmem:[#allocation24] sm:$0x3] }
 0xc00   : > { %v2038_v60 = vsub.s32 1, %v2033_v29 }
 0xc02   : > { %2957 = vmatpush1.bf16.msra.mxu1 %v2956_v62  ;;  %v2039_v62 = vrot.slane %v2030_v59, %v2038_v60 }
 0xc7a   : > { %v1973_v33 = vpop.xlane.xlu0 %1972 }
 0xc7b   : > { %v1975_v34 = vmul.f32 0.0078125, %v1973_v33  ;;  %v2978_v33 = vpack.c.bf16 %v2142_v31, %v2141_v30 }
 0xc7d   : > { %v4488_v35 = vsub.f32 %v1971_v0, %v1975_v34  ;;  %v2118_v0 = vld [vmem:[#allocation25 + $0x18] sm:$0xff]  ;;  %v2125_v34 = vld [vmem:[#allocation25 + $0x50] sm:$0xff] }
 0xc7e   : > { %v2964_v12 = vpack.c.bf16 %v2118_v0, %v2117_v9 }
 0xc7f   : > { %v1977_v24 = vmul.f32 %v4488_v35, %v4488_v35  ;;  %v1987_v44 = vmul.f32 %v2512_v43, %v4488_v35  ;;  %v2034_v35 = vsub.s32 0, %v2033_v29 }
 0xc80   : > { %2965 = vmatpush3.bf16.msra.mxu0 %v2964_v12 }
 0xc81   : > { %1978 = vadd.xlane.f32.xlu0 %v1977_v24  ;;  %2967 = vmatprep.subr.bf16.mxu0 %v2966_v13  ;;  %v2126_v24 = vld [vmem:[#allocation25 + $0x58] sm:$0xff]  ;;  %v2035_v61 = vrot.slane %v2030_v59, %v2034_v35 }
 0xc82   : > { %v2980_v38 = vpack.c.bf16 %v2126_v24, %v2125_v34 }
 0xc84   : > { %2969 = vmatpush3.bf16.msra.mxu0 %v2968_v18 }
 0xc85   : > { %2971 = vmatprep.subr.bf16.mxu0 %v2970_v19 }
 0xc88   : > { %2973 = vmatpush3.bf16.msra.mxu0 %v2972_v25 }
 0xc89   : > { %2975 = vmatprep.subr.bf16.mxu0 %v2974_v52 }
 0xc8c   : > { %2977 = vmatpush3.bf16.msra.mxu0 %v2976_v32 }
 0xc8d   : > { %2979 = vmatprep.subr.bf16.mxu0 %v2978_v33 }
 0xc90   : > { %2981 = vmatpush3.bf16.msra.mxu0 %v2980_v38 }
 0xc91   : > { %2983 = vmatprep.subr.bf16.mxu0 %v2982_v39 }
 0xc94   : > { %2985 = vmatpush3.bf16.msra.mxu0 %v2984_v51 }
 0xc95   : > { %2987 = vmatprep.subr.bf16.mxu0 %v2986_v55 }
 0xc98   : > { %2989 = vmatpush3.bf16.msra.mxu0 %v2988_v58 }
 0xd0e   : > { %v1979_v40 = vpop.xlane.xlu0 %1978 }
 0xd0f   : > { %v1980_v41 = vmul.f32 0.0078125, %v1979_v40 }
 0xd11   : > { %v1988_v42 = vadd.f32 1e-05, %v1980_v41 }
 0xd13   : > { %3204 = vrsqrt.f32 %v1988_v42 }
 0xd1d   : > { %v3205_v45 = vpop.eup %3204 }
 0xd1e   : > { %v1990_v47 = vmul.f32 %v3205_v45, %v1987_v44 }
 0xd20   : > { %v1997_v48 = vadd.f32 %v2513_v46, %v1990_v47 }
 0xd22   : > { %2107 = vmatmul.mubr.f32.vlgmr.msra.gmra.mrb[22].mxu1 %v1997_v48 }
 0xdf5   : > { %v2108_v63 = vpop.f32.mrb[22].mxu1 }
 0xdf6   : > { %v2109_v2 = vadd.f32 %v2108_v63, %v2035_v61  ;;  %v2110_v3 = vpop.f32.mrb[23].mxu1 }
 0xdf7   : > { %v2111_v4 = vadd.f32 %v2110_v3, %v2039_v62 }
 0xdf8   : > { %v2113_v6 = vmax.f32 %v2109_v2, 0.0 }
 0xdf9   : > { %v2114_v5 = vmax.f32 %v2111_v4, 0.0 }
 0xdfb   : > { %2218 = vmatprep.mubr.f32.mxu0 %v2114_v5 }
 0xdfc   : > { %2219 = vmatmul.mubr.f32.vlgmr.msra.gmra.mrb[8].mxu0 %v2113_v6 }
 0xecf   : > { %v2638_v1 = vpop.f32.mrb[8].mxu0 }
 0xed0   : > { %v2639_v8 = vpop.f32.mrb[9].mxu0 }
 0xed1   : > { %v2640_v9 = vadd.f32 %v2639_v8, %v2638_v1 }
 0xed3   : > { %v2221_v26 = vadd.f32 %v2640_v9, %v2514_v7 }
 0xed5   : > { %v2224_v0 = vadd.f32 %v2221_v26, %v1997_v48 }
 0xed7   : > { %2225 = vadd.xlane.f32.xlu0 %v2224_v0 }
 0xf64   : > { %v2226_v10 = vpop.xlane.xlu0 %2225 }
 0xf65   : > { %v2227_v11 = vmul.f32 0.0078125, %v2226_v10 }
 0xf67   : > { %v2228_v12 = vsub.f32 %v2224_v0, %v2227_v11 }
 0xf69   : > { %v2229_v13 = vmul.f32 %v2228_v12, %v2228_v12  ;;  %v2233_v17 = vmul.f32 %v2512_v43, %v2228_v12 }
 0xf6b   : > { %2230 = vadd.xlane.f32.xlu0 %v2229_v13 }
 0xff8   : > { %v2231_v14 = vpop.xlane.xlu0 %2230 }
 0xff9   : > { %v2232_v15 = vmul.f32 0.0078125, %v2231_v14 }
 0xffb   : > { %v2234_v16 = vadd.f32 1e-05, %v2232_v15 }
 0xffd   : > { %3206 = vrsqrt.f32 %v2234_v16 }
0x1007   : > { %v3207_v18 = vpop.eup %3206 }
0x1008   : > { %v2236_v19 = vmul.f32 %v3207_v18, %v2233_v17 }
0x100a   : > { %v2237_v20 = vadd.f32 %v2513_v46, %v2236_v19 }
0x100c   : > { %2238 = vst [vmem:[%s701_s20] sm:$0xff] %v2237_v20 }
0x100d   : > { %3653 = shalt.err (!%p3650_p12)
}
0x100e   : > { %s3654_s1 = scalar_lea.hbm %s4500_s21, 128  ;;  %s3658_s28 = scalar_lea.hbm %s4625_s30, 256 }
0x100f   : > { %p3655_p1 = scmp.ne.s32.totalorder %s4500_s21, %s3654_s1  ;;  %p3659_p3 = scmp.lt.u32.totalorder %s4500_s21, %s4625_s30 }
0x1010   : > { %p3660_p5 = scmp.lt.u32.totalorder %s3658_s28, %s3654_s1  ;;  %p3662_p7 = scmp.lt.u32.totalorder %s3654_s1, %s4500_s21 }
0x1011   : > { %p3656_p4 = pnand %p3655_p1, %p4626_p13 }
0x1012   : > { %p3661_p6 = por %p3660_p5, %p3659_p3 }
0x1013   : > { %p3657_p2 = pneg %p3656_p4 }
0x1014   : > { %p3663_p0 = por %p3662_p7, %p3661_p6 }
0x1016   : > { %p3664_p11 = pnand %p3663_p0, %p3657_p2 }
0x1018   : > { %3667 = shalt.err (!%p3664_p11)
}
0x1019   : > { %3048 = dma.vmem_to_hbm [thread:$0]  (%p4626_p13), %s4502_s3, 128, %s4500_s21, %s2240_s25  }
0x101a PF: > { %s4627_s4 = sld [smem:[#allocation39_spill]]  ;;  %p4628_p8 = scmp.ne.s32.totalorder %s4601_s26, 0 }
0x101b   : > { %p4629_p10 = scmp.ge.s32.totalorder %s3736_s18, 2 }
0x101d   : > { %p3098_p9 = pnand %p4629_p10, %p4628_p8 }
0x1020   : > { %s2265_s22 = sand.u32 1, %s4627_s4  }
0x1021   : > { %s2266_s23 = scalar_lea.sflag [#allocation6], %s2265_s22 }
0x1022   : > { %3719 = dma.done.wait (!%p3098_p9), %s2266_s23, 128  }
0x1023   : > { %3721 = vsyncadd (!%p3098_p9), %s2266_s23, 4294967168  ;;  %s4630_s1 = sld [smem:[#allocation40_spill]]  ;;  %s4631_s0 = sld [smem:[#allocation41_spill]] }
0x1024   : > { %p40_p12 = scmp.ge.s32.totalorder %s4229_s27, 4   ;;  %s4632_s18 = smov %s4229_s27 }
0x1026   :  { %42 = sbr.rel (!%p40_p12) target bundleno = 31 (0x1f), region = 181 }
0x102d   :  { %2271 = vsyncpa [#allocation5], 1 }
0x102e   :  { %2273 = vsyncpa [#allocation5 + $0x1], 1 }
0x102f   :  { %2274 = vsyncpa [#allocation8], 1 }
0x1030   :  { %2275 = vsyncpa [#allocation11], 1 }
0x1031   :  { %2276 = vsyncpa [#allocation14], 1 }
0x1032   :  { %2277 = vsyncpa [#allocation17], 1 }
0x1033   :  { %2278 = vsyncpa [#allocation20], 1 }
0x1034   :  { %2279 = vsyncpa [#allocation23], 1 }
0x1035   :  { %2280 = vsyncpa [#allocation26], 1 }
0x1036   :  { %2281 = vsyncpa [#allocation6], 1 }
0x1037   :  { %2283 = vsyncpa [#allocation6 + $0x1], 1 }

</bundles_post_ra>
